<compile_context>
chip_gen: v7x
topology: tpu7x:2x2x1
jax: 0.10.0
libtpu: 0.0.40
codegen_flags: <defaults>
</compile_context>

<pallas_src>
import functools
import math

import jax
import jax.numpy as jnp
from jax import lax
from jax.experimental import pallas as pl
from jax.experimental.pallas import tpu as pltpu

# Scoped-VMEM budget for the kernels below.  48 MiB is safe on every
# generation (v5e/v6e: 128 MiB physical, v7x: 64 MiB per TensorCore); raise it
# toward ~96 MiB on v5e/v6e if the linear/attention tiles are grown, keep it
# <= ~48 MiB on v7x.
_VMEM_LIMIT = 48 * 1024 * 1024


def _pick_tile(dim, target, granularities):
    """Largest tile <= target that divides `dim` and is a multiple of one of
    the preferred granularities (tried in order); falls back to the full dim
    (always BlockSpec-legal)."""
    if dim <= target:
        return dim
    for g in granularities:
        t = (target // g) * g
        while t >= g:
            if dim % t == 0:
                return t
            t -= g
    return dim


# ----------------------------------------------------------------------------
# Kernel 1: tiled dense linear layer  y = x @ W (+ b)
#   bf16 MXU operands, f32 VMEM accumulator, K axis is the reduction axis.
# ----------------------------------------------------------------------------
def _matmul_kernel(x_ref, w_ref, o_ref, acc_ref):
    k = pl.program_id(2)

    @pl.when(k == 0)
    def _():
        acc_ref[...] = jnp.zeros(acc_ref.shape, acc_ref.dtype)

    acc_ref[...] += jnp.dot(x_ref[...].astype(jnp.bfloat16),
                            w_ref[...].astype(jnp.bfloat16),
                            preferred_element_type=jnp.float32)

    @pl.when(k == pl.num_programs(2) - 1)
    def _():
        o_ref[...] = acc_ref[...].astype(o_ref.dtype)


def _matmul_bias_kernel(x_ref, w_ref, b_ref, o_ref, acc_ref):
    k = pl.program_id(2)

    @pl.when(k == 0)
    def _():
        acc_ref[...] = jnp.zeros(acc_ref.shape, acc_ref.dtype)

    acc_ref[...] += jnp.dot(x_ref[...].astype(jnp.bfloat16),
                            w_ref[...].astype(jnp.bfloat16),
                            preferred_element_type=jnp.float32)

    @pl.when(k == pl.num_programs(2) - 1)
    def _():
        o_ref[...] = (acc_ref[...] + b_ref[...].astype(jnp.float32)
                      ).astype(o_ref.dtype)


def linear(x, w, b=None, *, out_dtype=None, tm=512, tn=512, tk=512):
    """x: (M, K), w: (K, Nout) [ideally already bf16], b: (1, Nout) or None."""
    M, K = x.shape
    K2, Nout = w.shape
    assert K == K2
    if out_dtype is None:
        out_dtype = x.dtype
    tm = _pick_tile(M, tm, (16, 8))
    tn = _pick_tile(Nout, tn, (128,))
    tk = _pick_tile(K, tk, (128,))
    grid = (M // tm, Nout // tn, K // tk)

    in_specs = [
        pl.BlockSpec((tm, tk), lambda i, j, k: (i, k)),
        pl.BlockSpec((tk, tn), lambda i, j, k: (k, j)),
    ]
    args = [x, w]
    if b is not None:
        in_specs.append(pl.BlockSpec((1, tn), lambda i, j, k: (0, j)))
        args.append(b)
        kern = _matmul_bias_kernel
    else:
        kern = _matmul_kernel

    return pl.pallas_call(
        kern,
        out_shape=jax.ShapeDtypeStruct((M, Nout), out_dtype),
        grid=grid,
        in_specs=in_specs,
        out_specs=pl.BlockSpec((tm, tn), lambda i, j, k: (i, j)),
        scratch_shapes=[pltpu.VMEM((tm, tn), jnp.float32)],
        compiler_params=pltpu.CompilerParams(
            dimension_semantics=("parallel", "parallel", "arbitrary"),
            vmem_limit_bytes=_VMEM_LIMIT,
        ),
    )(*args)


# ----------------------------------------------------------------------------
# Kernel 2: flash-style multi-head attention over the (B, N, 3*H*D) qkv slab.
#   Online softmax over the KV grid axis, head-indexed f32 scratch, bf16
#   operands for both MXU matmuls, lane-dense (tq, H*D) output written once
#   per q tile.  Softmax scale is pre-folded into the q weights.
# ----------------------------------------------------------------------------
def _lane_slice(ref, base, h, head_dim):
    """(t, D) lane slice at offset base + h*head_dim (static when h is int)."""
    lo = base + h * head_dim
    if not isinstance(h, int):
        lo = pl.multiple_of(lo, head_dim)
    return ref[:, pl.ds(lo, head_dim)]


def _flash_inner(get_q, get_k, get_v, o_ref, m_ref, l_ref, acc_ref,
                 *, num_heads, head_dim):
    """One (q-tile, kv-tile) step of the online-softmax flash recurrence."""
    ki = pl.program_id(2)

    @pl.when(ki == 0)
    def _():
        m_ref[...] = jnp.full(m_ref.shape, -jnp.inf, m_ref.dtype)
        l_ref[...] = jnp.zeros(l_ref.shape, l_ref.dtype)
        acc_ref[...] = jnp.zeros(acc_ref.shape, acc_ref.dtype)

    def per_head(h):
        q_h = get_q(h).astype(jnp.bfloat16)            # (tq, D)
        k_h = get_k(h).astype(jnp.bfloat16)            # (tk, D)
        v_h = get_v(h).astype(jnp.bfloat16)            # (tk, D)

        # q @ k^T: contract the shared D axis directly (no explicit k.T).
        s = lax.dot_general(q_h, k_h, (((1,), (1,)), ((), ())),
                            preferred_element_type=jnp.float32)   # (tq, tk)

        m_prev = m_ref[h]                                           # (tq, 1)
        m_new = jnp.maximum(m_prev, jnp.max(s, axis=-1, keepdims=True))
        alpha = jnp.exp(m_prev - m_new)                             # (tq, 1)
        p = jnp.exp(s - m_new)                                      # (tq, tk)

        l_ref[h] = alpha * l_ref[h] + jnp.sum(p, axis=-1, keepdims=True)
        acc_ref[h] = alpha * acc_ref[h] + jnp.dot(
            p.astype(jnp.bfloat16), v_h, preferred_element_type=jnp.float32)
        m_ref[h] = m_new

    if num_heads <= 8:
        # Small head counts: static unroll -> all head slices are static.
        for h in range(num_heads):
            per_head(h)
    else:
        # Realistic head counts: fori_loop bounds per-head live ranges and
        # code size (head slices become multiple_of-hinted dynamic offsets).
        def body(h, carry):
            per_head(h)
            return carry
        lax.fori_loop(0, num_heads, body, 0)

    @pl.when(ki == pl.num_programs(2) - 1)
    def _():
        # Assemble the lane-dense (tq, H*D) output tile once per q tile.
        for h in range(num_heads):
            lo = h * head_dim
            o_ref[:, lo:lo + head_dim] = (
                acc_ref[h] * pl.reciprocal(l_ref[h], approx=True)
            ).astype(o_ref.dtype)


def _attn_kernel_split(q_ref, k_ref, v_ref, o_ref, m_ref, l_ref, acc_ref,
                       *, num_heads, head_dim):
    """q/k/v arrive as separate lane-dense (t, H*D) blocks."""
    _flash_inner(lambda h: _lane_slice(q_ref, 0, h, head_dim),
                 lambda h: _lane_slice(k_ref, 0, h, head_dim),
                 lambda h: _lane_slice(v_ref, 0, h, head_dim),
                 o_ref, m_ref, l_ref, acc_ref,
                 num_heads=num_heads, head_dim=head_dim)


def _attn_kernel_fused(qrow_ref, kvrow_ref, o_ref, m_ref, l_ref, acc_ref,
                       *, num_heads, head_dim):
    """Fallback: full (t, 3*H*D) qkv rows; q/k/v sliced in-kernel."""
    hd = num_heads * head_dim
    _flash_inner(lambda h: _lane_slice(qrow_ref, 0, h, head_dim),
                 lambda h: _lane_slice(kvrow_ref, hd, h, head_dim),
                 lambda h: _lane_slice(kvrow_ref, 2 * hd, h, head_dim),
                 o_ref, m_ref, l_ref, acc_ref,
                 num_heads=num_heads, head_dim=head_dim)


def attention_core(qkv, num_heads, head_dim, *, tq=256, tk=256,
                   out_dtype=None):
    """qkv: (B, N, 3*H*D) with [q | k | v] along the last axis -> (B, N, H*D)."""
    B, N, THD = qkv.shape
    HD = num_heads * head_dim
    assert THD == 3 * HD
    if out_dtype is None:
        out_dtype = qkv.dtype
    tq = _pick_tile(N, tq, (16, 8))
    tk = _pick_tile(N, tk, (128, 16, 8))
    grid = (B, N // tq, N // tk)

    out_spec = pl.BlockSpec((None, tq, HD), lambda b, qi, ki: (b, qi, 0))
    scratch = [
        pltpu.VMEM((num_heads, tq, 1), jnp.float32),          # running max
        pltpu.VMEM((num_heads, tq, 1), jnp.float32),          # running denom
        pltpu.VMEM((num_heads, tq, head_dim), jnp.float32),   # output acc
    ]
    params = pltpu.CompilerParams(
        dimension_semantics=("parallel", "parallel", "arbitrary"),
        vmem_limit_bytes=_VMEM_LIMIT,
    )

    if HD % 128 == 0:
        # Lane-dense path: q/k/v are disjoint 128-aligned H*D lane-blocks of
        # the qkv activation -> dense loads, no wasted HBM bytes.
        kern = functools.partial(_attn_kernel_split,
                                 num_heads=num_heads, head_dim=head_dim)
        in_specs = [
            pl.BlockSpec((None, tq, HD), lambda b, qi, ki: (b, qi, 0)),
            pl.BlockSpec((None, tk, HD), lambda b, qi, ki: (b, ki, 1)),
            pl.BlockSpec((None, tk, HD), lambda b, qi, ki: (b, ki, 2)),
        ]
        args = (qkv, qkv, qkv)
    else:
        # Small/odd H*D (test shapes): blocks cover the full 3*H*D minor dim
        # (always legal); q/k/v are static lane slices inside the kernel.
        kern = functools.partial(_attn_kernel_fused,
                                 num_heads=num_heads, head_dim=head_dim)
        in_specs = [
            pl.BlockSpec((None, tq, THD), lambda b, qi, ki: (b, qi, 0)),
            pl.BlockSpec((None, tk, THD), lambda b, qi, ki: (b, ki, 0)),
        ]
        args = (qkv, qkv)

    return pl.pallas_call(
        kern,
        out_shape=jax.ShapeDtypeStruct((B, N, HD), out_dtype),
        grid=grid,
        in_specs=in_specs,
        out_specs=out_spec,
        scratch_shapes=scratch,
        compiler_params=params,
    )(*args)


# ----------------------------------------------------------------------------
# Full module forward
# ----------------------------------------------------------------------------
def prepare_params(params, num_heads, head_dim, compute_dtype=jnp.bfloat16):
    """One-time parameter prep (hoisted out of the forward pass): fold the
    softmax scale into the q columns of the qkv weight and cast the weights to
    the MXU compute dtype so the in-kernel casts are no-ops."""
    HD = num_heads * head_dim
    scale = head_dim ** (-0.5)
    qkv_w = params["qkv_w"].at[:, :HD].multiply(scale)
    return {
        "qkv_w": qkv_w.astype(compute_dtype),
        "proj_w": params["proj_w"].astype(compute_dtype),
        "proj_b": params["proj_b"].astype(jnp.float32),
    }


def attention_forward(x, prep, num_heads, head_dim, *,
                      lin_tm=512, lin_tn=512, lin_tk=512,
                      attn_tq=256, attn_tk=256):
    """x: (B, N, C) f32, prep: output of prepare_params -> (B, N, C) f32."""
    # TODO(synk): fm_comp (Compressor_Decompressor), inter-layer token pruning
    # and intra-block row pruning depend on helpers not defined in the module
    # and are disabled on the default forward path; attn_drop / proj_drop are
    # identity in eval mode; padding_mask is None.  None of these are
    # implemented here.
    B, N, C = x.shape
    HD = num_heads * head_dim

    # qkv projection; bf16 output halves HBM traffic of the (B,N,3*H*D) slab.
    qkv = linear(x.reshape(B * N, C), prep["qkv_w"], None,
                 out_dtype=jnp.bfloat16, tm=lin_tm, tn=lin_tn, tk=lin_tk)
    qkv = qkv.reshape(B, N, 3 * HD)                  # free reshape

    # Fused flash-style attention; bf16 lane-dense (B, N, H*D) output.
    o = attention_core(qkv, num_heads, head_dim, tq=attn_tq, tk=attn_tk,
                       out_dtype=jnp.bfloat16)

    # Output projection (with bias), back to the input dtype.
    out = linear(o.reshape(B * N, HD), prep["proj_w"], prep["proj_b"],
                 out_dtype=x.dtype, tm=lin_tm, tn=lin_tn, tk=lin_tk)
    return out.reshape(B, N, C)


# ----------------------------------------------------------------------------
# References
# ----------------------------------------------------------------------------
def attention_forward_ref(x, params, num_heads, head_dim):
    """Pure-JAX f32 reference matching the PyTorch module math."""
    B, N, C = x.shape
    scale = head_dim ** (-0.5)
    qkv = x @ params["qkv_w"]
    qkv = qkv.reshape(B, N, 3, num_heads, head_dim).transpose(2, 0, 3, 1, 4)
    q, k, v = qkv[0], qkv[1], qkv[2]
    attn = jax.nn.softmax((q * scale) @ jnp.swapaxes(k, -2, -1), axis=-1)
    o = (attn @ v).transpose(0, 2, 1, 3).reshape(B, N, num_heads * head_dim)
    return o @ params["proj_w"] + params["proj_b"]


def attention_forward_bf16_ref(x, prep, num_heads, head_dim):
    """Pure-JAX reference mirroring the kernel numerics (bf16 operands and
    activations, f32 accumulation, scale pre-folded into the q weights)."""
    B, N, C = x.shape
    HD = num_heads * head_dim
    bf = jnp.bfloat16
    qkv = jnp.dot(x.reshape(B * N, C).astype(bf), prep["qkv_w"].astype(bf),
                  preferred_element_type=jnp.float32).astype(bf)
    qkv = qkv.reshape(B, N, 3, num_heads, head_dim)
    q, k, v = qkv[:, :, 0], qkv[:, :, 1], qkv[:, :, 2]
    s = jnp.einsum("bqhd,bkhd->bhqk", q, k, preferred_element_type=jnp.float32)
    p = jax.nn.softmax(s, axis=-1)
    o = jnp.einsum("bhqk,bkhd->bqhd", p.astype(bf), v,
                   preferred_element_type=jnp.float32)
    o = o.reshape(B * N, HD).astype(bf)
    out = jnp.dot(o, prep["proj_w"].astype(bf),
                  preferred_element_type=jnp.float32) + prep["proj_b"]
    return out.reshape(B, N, C).astype(x.dtype)


def init_params(key, dim, num_heads, head_dim, dtype=jnp.float32):
    k1, k2, k3 = jax.random.split(key, 3)
    inner = num_heads * head_dim
    # nn.Linear weight is (out, in); store transposed (in, out) for y = x @ W.
    qkv_w = jax.random.normal(k1, (dim, inner * 3), dtype) / math.sqrt(dim)
    proj_w = jax.random.normal(k2, (inner, dim), dtype) / math.sqrt(inner)
    proj_b = jax.random.normal(k3, (1, dim), dtype) * 0.02
    return {"qkv_w": qkv_w, "proj_w": proj_w, "proj_b": proj_b}


if __name__ == "__main__":
    def run_case(B, N, C, num_heads, head_dim, seed, **tiles):
        key = jax.random.PRNGKey(seed)
        kx, kp = jax.random.split(key)
        x = jax.random.normal(kx, (B, N, C), jnp.float32)
        params = init_params(kp, C, num_heads, head_dim)
        prep = prepare_params(params, num_heads, head_dim)   # one-time prep

        fwd = jax.jit(functools.partial(attention_forward,
                                        num_heads=num_heads,
                                        head_dim=head_dim, **tiles))
        out = jax.block_until_ready(fwd(x, prep))

        assert out.shape == (B, N, C)
        assert bool(jnp.all(jnp.isfinite(out)))
        ref_bf16 = attention_forward_bf16_ref(x, prep, num_heads, head_dim)
        ref_f32 = attention_forward_ref(x, params, num_heads, head_dim)
        # Tight check vs. a reference emulating the kernel's bf16 numerics;
        # loose sanity check vs. the exact-f32 module math.
        assert jnp.allclose(out, ref_bf16, atol=2e-2, rtol=2e-2), \
            "mismatch vs bf16-emulating reference"
        assert jnp.allclose(out, ref_f32, atol=1e-1, rtol=1e-1), \
            "mismatch vs f32 module reference"

    # Lane-dense path (H*D % 128 == 0), single-tile grids.
    run_case(2, 16, 128, 4, 32, seed=0)
    # Lane-dense path with multi-tile grids: 2 q-tiles x 2 KV-steps of the
    # online softmax, plus an M-tiled qkv/proj GEMM.
    run_case(2, 32, 128, 4, 32, seed=1, attn_tq=16, attn_tk=16, lin_tm=32)
    # Small-H*D fallback path (full-row qkv blocks), multi-step online softmax.
    run_case(2, 32, 32, 4, 8, seed=2, attn_tq=16, attn_tk=16)

    print("KERNEL_OK")
</pallas_src>

<mosaic_0001>
module attributes {stable_mosaic.version = 11 : i64} {
  func.func @_matmul_kernel(%arg0: i32, %arg1: i32, %arg2: i32, %arg3: memref<32x128xf32, #tpu.memory_space<vmem>>, %arg4: memref<128x384xbf16, #tpu.memory_space<vmem>>, %arg5: memref<32x384xbf16, #tpu.memory_space<vmem>>, %arg6: memref<32x384xf32, #tpu.memory_space<vmem>>) attributes {dimension_semantics = [#tpu.dimension_semantics<parallel>, #tpu.dimension_semantics<parallel>, #tpu.dimension_semantics<arbitrary>], iteration_bounds = array<i64: 1, 1, 1>, scalar_prefetch = 0 : i64, scratch_operands = 1 : i64, tpu.core_type = #tpu.core_type<tc>, window_params = [{transform_indices = @transform_0, window_bounds = array<i64: 32, 128>}, {transform_indices = @transform_1, window_bounds = array<i64: 128, 384>}, {transform_indices = @transform_2, window_bounds = array<i64: 32, 384>}]} {
    %c0_i32 = arith.constant 0 : i32
    %0 = arith.cmpi eq, %arg2, %c0_i32 : i32
    %1 = arith.extui %0 : i1 to i32
    %c0_i32_0 = arith.constant 0 : i32
    %2 = arith.cmpi ne, %1, %c0_i32_0 : i32
    scf.if %2 {
      %cst_10 = arith.constant 0.000000e+00 : f32
      %13 = vector.broadcast %cst_10 : f32 to vector<32x384xf32>
      %c0_11 = arith.constant 0 : index
      %c0_12 = arith.constant 0 : index
      %14 = vector.load %arg6[%c0_11, %c0_12] : memref<32x384xf32, #tpu.memory_space<vmem>>, vector<32x384xf32>
      tpu.vector_store %arg6[%c0_11, %c0_12], %13 {strides = array<i32>} : memref<32x384xf32, #tpu.memory_space<vmem>>, vector<32x384xf32>,
    } else {
    }
    %c0 = arith.constant 0 : index
    %c0_1 = arith.constant 0 : index
    %3 = vector.load %arg6[%c0, %c0_1] : memref<32x384xf32, #tpu.memory_space<vmem>>, vector<32x384xf32>
    %c0_2 = arith.constant 0 : index
    %c0_3 = arith.constant 0 : index
    %4 = vector.load %arg3[%c0_2, %c0_3] : memref<32x128xf32, #tpu.memory_space<vmem>>, vector<32x128xf32>
    %5 = arith.truncf %4 : vector<32x128xf32> to vector<32x128xbf16>
    %c0_4 = arith.constant 0 : index
    %c0_5 = arith.constant 0 : index
    %6 = vector.load %arg4[%c0_4, %c0_5] : memref<128x384xbf16, #tpu.memory_space<vmem>>, vector<128x384xbf16>
    %cst = arith.constant dense<0.000000e+00> : vector<32x384xf32>
    %7 = tpu.matmul %5, %6, %cst {dimension_numbers = #tpu.dot_dimension_numbers<[1], [0], [0], [1], [0, 0, 1, 1], [], []>} : vector<32x128xbf16>, vector<128x384xbf16>, vector<32x384xf32> -> vector<32x384xf32>
    %8 = arith.addf %3, %7 : vector<32x384xf32>
    %c0_6 = arith.constant 0 : index
    %c0_7 = arith.constant 0 : index
    %9 = vector.load %arg6[%c0_6, %c0_7] : memref<32x384xf32, #tpu.memory_space<vmem>>, vector<32x384xf32>
    tpu.vector_store %arg6[%c0_6, %c0_7], %8 {strides = array<i32>} : memref<32x384xf32, #tpu.memory_space<vmem>>, vector<32x384xf32>,
    %c0_i32_8 = arith.constant 0 : i32
    %10 = arith.cmpi eq, %arg2, %c0_i32_8 : i32
    %11 = arith.extui %10 : i1 to i32
    %c0_i32_9 = arith.constant 0 : i32
    %12 = arith.cmpi ne, %11, %c0_i32_9 : i32
    scf.if %12 {
      %c0_10 = arith.constant 0 : index
      %c0_11 = arith.constant 0 : index
      %13 = vector.load %arg6[%c0_10, %c0_11] : memref<32x384xf32, #tpu.memory_space<vmem>>, vector<32x384xf32>
      %14 = arith.truncf %13 : vector<32x384xf32> to vector<32x384xbf16>
      %c0_12 = arith.constant 0 : index
      %c0_13 = arith.constant 0 : index
      %15 = vector.load %arg5[%c0_12, %c0_13] : memref<32x384xbf16, #tpu.memory_space<vmem>>, vector<32x384xbf16>
      tpu.vector_store %arg5[%c0_12, %c0_13], %14 {strides = array<i32>} : memref<32x384xbf16, #tpu.memory_space<vmem>>, vector<32x384xbf16>,
    } else {
    }
    return
  }
  func.func @transform_0(%arg0: i32, %arg1: i32, %arg2: i32) -> (i32, i32) {
    %c0_i32 = arith.constant 0 : i32
    return %arg0, %arg2 : i32, i32
  }
  func.func @transform_1(%arg0: i32, %arg1: i32, %arg2: i32) -> (i32, i32) {
    %c0_i32 = arith.constant 0 : i32
    return %arg2, %arg1 : i32, i32
  }
  func.func @transform_2(%arg0: i32, %arg1: i32, %arg2: i32) -> (i32, i32) {
    %c0_i32 = arith.constant 0 : i32
    return %arg0, %arg1 : i32, i32
  }
}

module attributes {stable_mosaic.version = 11 : i64} {
  func.func @_matmul_bias_kernel(%arg0: i32, %arg1: i32, %arg2: i32, %arg3: memref<32x128xbf16, #tpu.memory_space<vmem>>, %arg4: memref<128x128xbf16, #tpu.memory_space<vmem>>, %arg5: memref<1x128xf32, #tpu.memory_space<vmem>>, %arg6: memref<32x128xf32, #tpu.memory_space<vmem>>, %arg7: memref<32x128xf32, #tpu.memory_space<vmem>>) attributes {dimension_semantics = [#tpu.dimension_semantics<parallel>, #tpu.dimension_semantics<parallel>, #tpu.dimension_semantics<arbitrary>], iteration_bounds = array<i64: 1, 1, 1>, scalar_prefetch = 0 : i64, scratch_operands = 1 : i64, tpu.core_type = #tpu.core_type<tc>, window_params = [{transform_indices = @transform_0, window_bounds = array<i64: 32, 128>}, {transform_indices = @transform_1, window_bounds = array<i64: 128, 128>}, {transform_indices = @transform_2, window_bounds = array<i64: 1, 128>}, {transform_indices = @transform_3, window_bounds = array<i64: 32, 128>}]} {
    %c0_i32 = arith.constant 0 : i32
    %0 = arith.cmpi eq, %arg2, %c0_i32 : i32
    %1 = arith.extui %0 : i1 to i32
    %c0_i32_0 = arith.constant 0 : i32
    %2 = arith.cmpi ne, %1, %c0_i32_0 : i32
    scf.if %2 {
      %cst_10 = arith.constant 0.000000e+00 : f32
      %12 = vector.broadcast %cst_10 : f32 to vector<32x128xf32>
      %c0_11 = arith.constant 0 : index
      %c0_12 = arith.constant 0 : index
      %13 = vector.load %arg7[%c0_11, %c0_12] : memref<32x128xf32, #tpu.memory_space<vmem>>, vector<32x128xf32>
      tpu.vector_store %arg7[%c0_11, %c0_12], %12 {strides = array<i32>} : memref<32x128xf32, #tpu.memory_space<vmem>>, vector<32x128xf32>,
    } else {
    }
    %c0 = arith.constant 0 : index
    %c0_1 = arith.constant 0 : index
    %3 = vector.load %arg7[%c0, %c0_1] : memref<32x128xf32, #tpu.memory_space<vmem>>, vector<32x128xf32>
    %c0_2 = arith.constant 0 : index
    %c0_3 = arith.constant 0 : index
    %4 = vector.load %arg3[%c0_2, %c0_3] : memref<32x128xbf16, #tpu.memory_space<vmem>>, vector<32x128xbf16>
    %c0_4 = arith.constant 0 : index
    %c0_5 = arith.constant 0 : index
    %5 = vector.load %arg4[%c0_4, %c0_5] : memref<128x128xbf16, #tpu.memory_space<vmem>>, vector<128x128xbf16>
    %cst = arith.constant dense<0.000000e+00> : vector<32x128xf32>
    %6 = tpu.matmul %4, %5, %cst {dimension_numbers = #tpu.dot_dimension_numbers<[1], [0], [0], [1], [0, 0, 1, 1], [], []>} : vector<32x128xbf16>, vector<128x128xbf16>, vector<32x128xf32> -> vector<32x128xf32>
    %7 = arith.addf %3, %6 : vector<32x128xf32>
    %c0_6 = arith.constant 0 : index
    %c0_7 = arith.constant 0 : index
    %8 = vector.load %arg7[%c0_6, %c0_7] : memref<32x128xf32, #tpu.memory_space<vmem>>, vector<32x128xf32>
    tpu.vector_store %arg7[%c0_6, %c0_7], %7 {strides = array<i32>} : memref<32x128xf32, #tpu.memory_space<vmem>>, vector<32x128xf32>,
    %c0_i32_8 = arith.constant 0 : i32
    %9 = arith.cmpi eq, %arg2, %c0_i32_8 : i32
    %10 = arith.extui %9 : i1 to i32
    %c0_i32_9 = arith.constant 0 : i32
    %11 = arith.cmpi ne, %10, %c0_i32_9 : i32
    scf.if %11 {
      %c0_10 = arith.constant 0 : index
      %c0_11 = arith.constant 0 : index
      %12 = vector.load %arg7[%c0_10, %c0_11] : memref<32x128xf32, #tpu.memory_space<vmem>>, vector<32x128xf32>
      %c0_12 = arith.constant 0 : index
      %c0_13 = arith.constant 0 : index
      %13 = vector.load %arg5[%c0_12, %c0_13] : memref<1x128xf32, #tpu.memory_space<vmem>>, vector<1x128xf32>
      %14 = vector.broadcast %13 : vector<1x128xf32> to vector<32x128xf32>
      %15 = arith.addf %12, %14 : vector<32x128xf32>
      %c0_14 = arith.constant 0 : index
      %c0_15 = arith.constant 0 : index
      %16 = vector.load %arg6[%c0_14, %c0_15] : memref<32x128xf32, #tpu.memory_space<vmem>>, vector<32x128xf32>
      tpu.vector_store %arg6[%c0_14, %c0_15], %15 {strides = array<i32>} : memref<32x128xf32, #tpu.memory_space<vmem>>, vector<32x128xf32>,
    } else {
    }
    return
  }
  func.func @transform_0(%arg0: i32, %arg1: i32, %arg2: i32) -> (i32, i32) {
    %c0_i32 = arith.constant 0 : i32
    return %arg0, %arg2 : i32, i32
  }
  func.func @transform_1(%arg0: i32, %arg1: i32, %arg2: i32) -> (i32, i32) {
    %c0_i32 = arith.constant 0 : i32
    return %arg2, %arg1 : i32, i32
  }
  func.func @transform_2(%arg0: i32, %arg1: i32, %arg2: i32) -> (i32, i32) {
    %c0_i32 = arith.constant 0 : i32
    %c0_i32_0 = arith.constant 0 : i32
    return %c0_i32, %arg1 : i32, i32
  }
  func.func @transform_3(%arg0: i32, %arg1: i32, %arg2: i32) -> (i32, i32) {
    %c0_i32 = arith.constant 0 : i32
    return %arg0, %arg1 : i32, i32
  }
}

module attributes {stable_mosaic.version = 11 : i64} {
  func.func @_attn_kernel_split(%arg0: i32, %arg1: i32, %arg2: i32, %arg3: memref<1x16x128xbf16, #tpu.memory_space<vmem>>, %arg4: memref<1x16x128xbf16, #tpu.memory_space<vmem>>, %arg5: memref<1x16x128xbf16, #tpu.memory_space<vmem>>, %arg6: memref<1x16x128xbf16, #tpu.memory_space<vmem>>, %arg7: memref<4x16x1xf32, #tpu.memory_space<vmem>>, %arg8: memref<4x16x1xf32, #tpu.memory_space<vmem>>, %arg9: memref<4x16x32xf32, #tpu.memory_space<vmem>>) attributes {dimension_semantics = [#tpu.dimension_semantics<parallel>, #tpu.dimension_semantics<parallel>, #tpu.dimension_semantics<arbitrary>], iteration_bounds = array<i64: 2, 1, 1>, scalar_prefetch = 0 : i64, scratch_operands = 3 : i64, tpu.core_type = #tpu.core_type<tc>, window_params = [{transform_indices = @transform_0, window_bounds = array<i64: 1, 16, 128>}, {transform_indices = @transform_1, window_bounds = array<i64: 1, 16, 128>}, {transform_indices = @transform_2, window_bounds = array<i64: 1, 16, 128>}, {transform_indices = @transform_3, window_bounds = array<i64: 1, 16, 128>}]} {
    %c0_i32 = arith.constant 0 : i32
    %0 = arith.cmpi eq, %arg2, %c0_i32 : i32
    %1 = arith.extui %0 : i1 to i32
    %c0_i32_0 = arith.constant 0 : i32
    %2 = arith.cmpi ne, %1, %c0_i32_0 : i32
    scf.if %2 {
      %cst_119 = arith.constant 0xFF800000 : f32
      %162 = vector.broadcast %cst_119 : f32 to vector<4x16x1xf32>
      %c0_120 = arith.constant 0 : index
      %c0_121 = arith.constant 0 : index
      %c0_122 = arith.constant 0 : index
      %163 = vector.load %arg7[%c0_120, %c0_121, %c0_122] : memref<4x16x1xf32, #tpu.memory_space<vmem>>, vector<4x16x1xf32>
      tpu.vector_store %arg7[%c0_120, %c0_121, %c0_122], %162 {strides = array<i32>} : memref<4x16x1xf32, #tpu.memory_space<vmem>>, vector<4x16x1xf32>,
      %cst_123 = arith.constant 0.000000e+00 : f32
      %164 = vector.broadcast %cst_123 : f32 to vector<4x16x1xf32>
      %c0_124 = arith.constant 0 : index
      %c0_125 = arith.constant 0 : index
      %c0_126 = arith.constant 0 : index
      %165 = vector.load %arg8[%c0_124, %c0_125, %c0_126] : memref<4x16x1xf32, #tpu.memory_space<vmem>>, vector<4x16x1xf32>
      tpu.vector_store %arg8[%c0_124, %c0_125, %c0_126], %164 {strides = array<i32>} : memref<4x16x1xf32, #tpu.memory_space<vmem>>, vector<4x16x1xf32>,
      %cst_127 = arith.constant 0.000000e+00 : f32
      %166 = vector.broadcast %cst_127 : f32 to vector<4x16x32xf32>
      %c0_128 = arith.constant 0 : index
      %c0_129 = arith.constant 0 : index
      %c0_130 = arith.constant 0 : index
      %167 = vector.load %arg9[%c0_128, %c0_129, %c0_130] : memref<4x16x32xf32, #tpu.memory_space<vmem>>, vector<4x16x32xf32>
      tpu.vector_store %arg9[%c0_128, %c0_129, %c0_130], %166 {strides = array<i32>} : memref<4x16x32xf32, #tpu.memory_space<vmem>>, vector<4x16x32xf32>,
    } else {
    }
    %c0 = arith.constant 0 : index
    %c0_1 = arith.constant 0 : index
    %c0_2 = arith.constant 0 : index
    %3 = vector.load %arg3[%c0, %c0_1, %c0_2] : memref<1x16x128xbf16, #tpu.memory_space<vmem>>, vector<1x16x32xbf16>
    %4 = vector.shape_cast %3 : vector<1x16x32xbf16> to vector<16x32xbf16>
    %c0_3 = arith.constant 0 : index
    %c0_4 = arith.constant 0 : index
    %c0_5 = arith.constant 0 : index
    %5 = vector.load %arg4[%c0_3, %c0_4, %c0_5] : memref<1x16x128xbf16, #tpu.memory_space<vmem>>, vector<1x16x32xbf16>
    %6 = vector.shape_cast %5 : vector<1x16x32xbf16> to vector<16x32xbf16>
    %c0_6 = arith.constant 0 : index
    %c0_7 = arith.constant 0 : index
    %c0_8 = arith.constant 0 : index
    %7 = vector.load %arg5[%c0_6, %c0_7, %c0_8] : memref<1x16x128xbf16, #tpu.memory_space<vmem>>, vector<1x16x32xbf16>
    %8 = vector.shape_cast %7 : vector<1x16x32xbf16> to vector<16x32xbf16>
    %cst = arith.constant dense<0.000000e+00> : vector<16x16xf32>
    %9 = tpu.matmul %4, %6, %cst {dimension_numbers = #tpu.dot_dimension_numbers<[1], [1], [0], [0], [0, 0, 1, 0], [], []>} : vector<16x32xbf16>, vector<16x32xbf16>, vector<16x16xf32> -> vector<16x16xf32>
    %c0_9 = arith.constant 0 : index
    %c0_10 = arith.constant 0 : index
    %c0_11 = arith.constant 0 : index
    %10 = vector.load %arg7[%c0_9, %c0_10, %c0_11] : memref<4x16x1xf32, #tpu.memory_space<vmem>>, vector<1x16x1xf32>
    %11 = vector.shape_cast %10 : vector<1x16x1xf32> to vector<16x1xf32>
    %cst_12 = arith.constant dense<0xFF800000> : vector<16xf32>
    %12 = vector.multi_reduction <maximumf>, %9, %cst_12 [1] : vector<16x16xf32> to vector<16xf32>
    %13 = vector.shape_cast %12 : vector<16xf32> to vector<16x1xf32>
    %14 = arith.maximumf %11, %13 : vector<16x1xf32>
    %15 = arith.subf %11, %14 : vector<16x1xf32>
    %16 = math.exp %15 : vector<16x1xf32>
    %17 = vector.broadcast %14 : vector<16x1xf32> to vector<16x16xf32>
    %18 = arith.subf %9, %17 : vector<16x16xf32>
    %19 = math.exp %18 : vector<16x16xf32>
    %c0_13 = arith.constant 0 : index
    %c0_14 = arith.constant 0 : index
    %c0_15 = arith.constant 0 : index
    %20 = vector.load %arg8[%c0_13, %c0_14, %c0_15] : memref<4x16x1xf32, #tpu.memory_space<vmem>>, vector<1x16x1xf32>
    %21 = vector.shape_cast %20 : vector<1x16x1xf32> to vector<16x1xf32>
    %22 = arith.mulf %16, %21 : vector<16x1xf32>
    %cst_16 = arith.constant dense<0.000000e+00> : vector<16xf32>
    %23 = vector.multi_reduction <add>, %19, %cst_16 [1] : vector<16x16xf32> to vector<16xf32>
    %24 = vector.shape_cast %23 : vector<16xf32> to vector<16x1xf32>
    %25 = arith.addf %22, %24 : vector<16x1xf32>
    %c0_17 = arith.constant 0 : index
    %c0_18 = arith.constant 0 : index
    %c0_19 = arith.constant 0 : index
    %26 = vector.load %arg8[%c0_17, %c0_18, %c0_19] : memref<4x16x1xf32, #tpu.memory_space<vmem>>, vector<1x16x1xf32>
    %27 = vector.shape_cast %26 : vector<1x16x1xf32> to vector<16x1xf32>
    %28 = vector.shape_cast %25 : vector<16x1xf32> to vector<1x16x1xf32>
    tpu.vector_store %arg8[%c0_17, %c0_18, %c0_19], %28 {strides = array<i32>} : memref<4x16x1xf32, #tpu.memory_space<vmem>>, vector<1x16x1xf32>,
    %c0_20 = arith.constant 0 : index
    %c0_21 = arith.constant 0 : index
    %c0_22 = arith.constant 0 : index
    %29 = vector.load %arg9[%c0_20, %c0_21, %c0_22] : memref<4x16x32xf32, #tpu.memory_space<vmem>>, vector<1x16x32xf32>
    %30 = vector.shape_cast %29 : vector<1x16x32xf32> to vector<16x32xf32>
    %31 = vector.broadcast %16 : vector<16x1xf32> to vector<16x32xf32>
    %32 = arith.mulf %31, %30 : vector<16x32xf32>
    %33 = arith.truncf %19 : vector<16x16xf32> to vector<16x16xbf16>
    %cst_23 = arith.constant dense<0.000000e+00> : vector<16x32xf32>
    %34 = tpu.matmul %33, %8, %cst_23 {dimension_numbers = #tpu.dot_dimension_numbers<[1], [0], [0], [1], [0, 0, 1, 1], [], []>} : vector<16x16xbf16>, vector<16x32xbf16>, vector<16x32xf32> -> vector<16x32xf32>
    %35 = arith.addf %32, %34 : vector<16x32xf32>
    %c0_24 = arith.constant 0 : index
    %c0_25 = arith.constant 0 : index
    %c0_26 = arith.constant 0 : index
    %36 = vector.load %arg9[%c0_24, %c0_25, %c0_26] : memref<4x16x32xf32, #tpu.memory_space<vmem>>, vector<1x16x32xf32>
    %37 = vector.shape_cast %36 : vector<1x16x32xf32> to vector<16x32xf32>
    %38 = vector.shape_cast %35 : vector<16x32xf32> to vector<1x16x32xf32>
    tpu.vector_store %arg9[%c0_24, %c0_25, %c0_26], %38 {strides = array<i32>} : memref<4x16x32xf32, #tpu.memory_space<vmem>>, vector<1x16x32xf32>,
    %c0_27 = arith.constant 0 : index
    %c0_28 = arith.constant 0 : index
    %c0_29 = arith.constant 0 : index
    %39 = vector.load %arg7[%c0_27, %c0_28, %c0_29] : memref<4x16x1xf32, #tpu.memory_space<vmem>>, vector<1x16x1xf32>
    %40 = vector.shape_cast %39 : vector<1x16x1xf32> to vector<16x1xf32>
    %41 = vector.shape_cast %14 : vector<16x1xf32> to vector<1x16x1xf32>
    tpu.vector_store %arg7[%c0_27, %c0_28, %c0_29], %41 {strides = array<i32>} : memref<4x16x1xf32, #tpu.memory_space<vmem>>, vector<1x16x1xf32>,
    %c0_30 = arith.constant 0 : index
    %c0_31 = arith.constant 0 : index
    %c32 = arith.constant 32 : index
    %42 = vector.load %arg3[%c0_30, %c0_31, %c32] : memref<1x16x128xbf16, #tpu.memory_space<vmem>>, vector<1x16x32xbf16>
    %43 = vector.shape_cast %42 : vector<1x16x32xbf16> to vector<16x32xbf16>
    %c0_32 = arith.constant 0 : index
    %c0_33 = arith.constant 0 : index
    %c32_34 = arith.constant 32 : index
    %44 = vector.load %arg4[%c0_32, %c0_33, %c32_34] : memref<1x16x128xbf16, #tpu.memory_space<vmem>>, vector<1x16x32xbf16>
    %45 = vector.shape_cast %44 : vector<1x16x32xbf16> to vector<16x32xbf16>
    %c0_35 = arith.constant 0 : index
    %c0_36 = arith.constant 0 : index
    %c32_37 = arith.constant 32 : index
    %46 = vector.load %arg5[%c0_35, %c0_36, %c32_37] : memref<1x16x128xbf16, #tpu.memory_space<vmem>>, vector<1x16x32xbf16>
    %47 = vector.shape_cast %46 : vector<1x16x32xbf16> to vector<16x32xbf16>
    %cst_38 = arith.constant dense<0.000000e+00> : vector<16x16xf32>
    %48 = tpu.matmul %43, %45, %cst_38 {dimension_numbers = #tpu.dot_dimension_numbers<[1], [1], [0], [0], [0, 0, 1, 0], [], []>} : vector<16x32xbf16>, vector<16x32xbf16>, vector<16x16xf32> -> vector<16x16xf32>
    %c1 = arith.constant 1 : index
    %c0_39 = arith.constant 0 : index
    %c0_40 = arith.constant 0 : index
    %49 = vector.load %arg7[%c1, %c0_39, %c0_40] : memref<4x16x1xf32, #tpu.memory_space<vmem>>, vector<1x16x1xf32>
    %50 = vector.shape_cast %49 : vector<1x16x1xf32> to vector<16x1xf32>
    %cst_41 = arith.constant dense<0xFF800000> : vector<16xf32>
    %51 = vector.multi_reduction <maximumf>, %48, %cst_41 [1] : vector<16x16xf32> to vector<16xf32>
    %52 = vector.shape_cast %51 : vector<16xf32> to vector<16x1xf32>
    %53 = arith.maximumf %50, %52 : vector<16x1xf32>
    %54 = arith.subf %50, %53 : vector<16x1xf32>
    %55 = math.exp %54 : vector<16x1xf32>
    %56 = vector.broadcast %53 : vector<16x1xf32> to vector<16x16xf32>
    %57 = arith.subf %48, %56 : vector<16x16xf32>
    %58 = math.exp %57 : vector<16x16xf32>
    %c1_42 = arith.constant 1 : index
    %c0_43 = arith.constant 0 : index
    %c0_44 = arith.constant 0 : index
    %59 = vector.load %arg8[%c1_42, %c0_43, %c0_44] : memref<4x16x1xf32, #tpu.memory_space<vmem>>, vector<1x16x1xf32>
    %60 = vector.shape_cast %59 : vector<1x16x1xf32> to vector<16x1xf32>
    %61 = arith.mulf %55, %60 : vector<16x1xf32>
    %cst_45 = arith.constant dense<0.000000e+00> : vector<16xf32>
    %62 = vector.multi_reduction <add>, %58, %cst_45 [1] : vector<16x16xf32> to vector<16xf32>
    %63 = vector.shape_cast %62 : vector<16xf32> to vector<16x1xf32>
    %64 = arith.addf %61, %63 : vector<16x1xf32>
    %c1_46 = arith.constant 1 : index
    %c0_47 = arith.constant 0 : index
    %c0_48 = arith.constant 0 : index
    %65 = vector.load %arg8[%c1_46, %c0_47, %c0_48] : memref<4x16x1xf32, #tpu.memory_space<vmem>>, vector<1x16x1xf32>
    %66 = vector.shape_cast %65 : vector<1x16x1xf32> to vector<16x1xf32>
    %67 = vector.shape_cast %64 : vector<16x1xf32> to vector<1x16x1xf32>
    tpu.vector_store %arg8[%c1_46, %c0_47, %c0_48], %67 {strides = array<i32>} : memref<4x16x1xf32, #tpu.memory_space<vmem>>, vector<1x16x1xf32>,
    %c1_49 = arith.constant 1 : index
    %c0_50 = arith.constant 0 : index
    %c0_51 = arith.constant 0 : index
    %68 = vector.load %arg9[%c1_49, %c0_50, %c0_51] : memref<4x16x32xf32, #tpu.memory_space<vmem>>, vector<1x16x32xf32>
    %69 = vector.shape_cast %68 : vector<1x16x32xf32> to vector<16x32xf32>
    %70 = vector.broadcast %55 : vector<16x1xf32> to vector<16x32xf32>
    %71 = arith.mulf %70, %69 : vector<16x32xf32>
    %72 = arith.truncf %58 : vector<16x16xf32> to vector<16x16xbf16>
    %cst_52 = arith.constant dense<0.000000e+00> : vector<16x32xf32>
    %73 = tpu.matmul %72, %47, %cst_52 {dimension_numbers = #tpu.dot_dimension_numbers<[1], [0], [0], [1], [0, 0, 1, 1], [], []>} : vector<16x16xbf16>, vector<16x32xbf16>, vector<16x32xf32> -> vector<16x32xf32>
    %74 = arith.addf %71, %73 : vector<16x32xf32>
    %c1_53 = arith.constant 1 : index
    %c0_54 = arith.constant 0 : index
    %c0_55 = arith.constant 0 : index
    %75 = vector.load %arg9[%c1_53, %c0_54, %c0_55] : memref<4x16x32xf32, #tpu.memory_space<vmem>>, vector<1x16x32xf32>
    %76 = vector.shape_cast %75 : vector<1x16x32xf32> to vector<16x32xf32>
    %77 = vector.shape_cast %74 : vector<16x32xf32> to vector<1x16x32xf32>
    tpu.vector_store %arg9[%c1_53, %c0_54, %c0_55], %77 {strides = array<i32>} : memref<4x16x32xf32, #tpu.memory_space<vmem>>, vector<1x16x32xf32>,
    %c1_56 = arith.constant 1 : index
    %c0_57 = arith.constant 0 : index
    %c0_58 = arith.constant 0 : index
    %78 = vector.load %arg7[%c1_56, %c0_57, %c0_58] : memref<4x16x1xf32, #tpu.memory_space<vmem>>, vector<1x16x1xf32>
    %79 = vector.shape_cast %78 : vector<1x16x1xf32> to vector<16x1xf32>
    %80 = vector.shape_cast %53 : vector<16x1xf32> to vector<1x16x1xf32>
    tpu.vector_store %arg7[%c1_56, %c0_57, %c0_58], %80 {strides = array<i32>} : memref<4x16x1xf32, #tpu.memory_space<vmem>>, vector<1x16x1xf32>,
    %c0_59 = arith.constant 0 : index
    %c0_60 = arith.constant 0 : index
    %c64 = arith.constant 64 : index
    %81 = vector.load %arg3[%c0_59, %c0_60, %c64] : memref<1x16x128xbf16, #tpu.memory_space<vmem>>, vector<1x16x32xbf16>
    %82 = vector.shape_cast %81 : vector<1x16x32xbf16> to vector<16x32xbf16>
    %c0_61 = arith.constant 0 : index
    %c0_62 = arith.constant 0 : index
    %c64_63 = arith.constant 64 : index
    %83 = vector.load %arg4[%c0_61, %c0_62, %c64_63] : memref<1x16x128xbf16, #tpu.memory_space<vmem>>, vector<1x16x32xbf16>
    %84 = vector.shape_cast %83 : vector<1x16x32xbf16> to vector<16x32xbf16>
    %c0_64 = arith.constant 0 : index
    %c0_65 = arith.constant 0 : index
    %c64_66 = arith.constant 64 : index
    %85 = vector.load %arg5[%c0_64, %c0_65, %c64_66] : memref<1x16x128xbf16, #tpu.memory_space<vmem>>, vector<1x16x32xbf16>
    %86 = vector.shape_cast %85 : vector<1x16x32xbf16> to vector<16x32xbf16>
    %cst_67 = arith.constant dense<0.000000e+00> : vector<16x16xf32>
    %87 = tpu.matmul %82, %84, %cst_67 {dimension_numbers = #tpu.dot_dimension_numbers<[1], [1], [0], [0], [0, 0, 1, 0], [], []>} : vector<16x32xbf16>, vector<16x32xbf16>, vector<16x16xf32> -> vector<16x16xf32>
    %c2 = arith.constant 2 : index
    %c0_68 = arith.constant 0 : index
    %c0_69 = arith.constant 0 : index
    %88 = vector.load %arg7[%c2, %c0_68, %c0_69] : memref<4x16x1xf32, #tpu.memory_space<vmem>>, vector<1x16x1xf32>
    %89 = vector.shape_cast %88 : vector<1x16x1xf32> to vector<16x1xf32>
    %cst_70 = arith.constant dense<0xFF800000> : vector<16xf32>
    %90 = vector.multi_reduction <maximumf>, %87, %cst_70 [1] : vector<16x16xf32> to vector<16xf32>
    %91 = vector.shape_cast %90 : vector<16xf32> to vector<16x1xf32>
    %92 = arith.maximumf %89, %91 : vector<16x1xf32>
    %93 = arith.subf %89, %92 : vector<16x1xf32>
    %94 = math.exp %93 : vector<16x1xf32>
    %95 = vector.broadcast %92 : vector<16x1xf32> to vector<16x16xf32>
    %96 = arith.subf %87, %95 : vector<16x16xf32>
    %97 = math.exp %96 : vector<16x16xf32>
    %c2_71 = arith.constant 2 : index
    %c0_72 = arith.constant 0 : index
    %c0_73 = arith.constant 0 : index
    %98 = vector.load %arg8[%c2_71, %c0_72, %c0_73] : memref<4x16x1xf32, #tpu.memory_space<vmem>>, vector<1x16x1xf32>
    %99 = vector.shape_cast %98 : vector<1x16x1xf32> to vector<16x1xf32>
    %100 = arith.mulf %94, %99 : vector<16x1xf32>
    %cst_74 = arith.constant dense<0.000000e+00> : vector<16xf32>
    %101 = vector.multi_reduction <add>, %97, %cst_74 [1] : vector<16x16xf32> to vector<16xf32>
    %102 = vector.shape_cast %101 : vector<16xf32> to vector<16x1xf32>
    %103 = arith.addf %100, %102 : vector<16x1xf32>
    %c2_75 = arith.constant 2 : index
    %c0_76 = arith.constant 0 : index
    %c0_77 = arith.constant 0 : index
    %104 = vector.load %arg8[%c2_75, %c0_76, %c0_77] : memref<4x16x1xf32, #tpu.memory_space<vmem>>, vector<1x16x1xf32>
    %105 = vector.shape_cast %104 : vector<1x16x1xf32> to vector<16x1xf32>
    %106 = vector.shape_cast %103 : vector<16x1xf32> to vector<1x16x1xf32>
    tpu.vector_store %arg8[%c2_75, %c0_76, %c0_77], %106 {strides = array<i32>} : memref<4x16x1xf32, #tpu.memory_space<vmem>>, vector<1x16x1xf32>,
    %c2_78 = arith.constant 2 : index
    %c0_79 = arith.constant 0 : index
    %c0_80 = arith.constant 0 : index
    %107 = vector.load %arg9[%c2_78, %c0_79, %c0_80] : memref<4x16x32xf32, #tpu.memory_space<vmem>>, vector<1x16x32xf32>
    %108 = vector.shape_cast %107 : vector<1x16x32xf32> to vector<16x32xf32>
    %109 = vector.broadcast %94 : vector<16x1xf32> to vector<16x32xf32>
    %110 = arith.mulf %109, %108 : vector<16x32xf32>
    %111 = arith.truncf %97 : vector<16x16xf32> to vector<16x16xbf16>
    %cst_81 = arith.constant dense<0.000000e+00> : vector<16x32xf32>
    %112 = tpu.matmul %111, %86, %cst_81 {dimension_numbers = #tpu.dot_dimension_numbers<[1], [0], [0], [1], [0, 0, 1, 1], [], []>} : vector<16x16xbf16>, vector<16x32xbf16>, vector<16x32xf32> -> vector<16x32xf32>
    %113 = arith.addf %110, %112 : vector<16x32xf32>
    %c2_82 = arith.constant 2 : index
    %c0_83 = arith.constant 0 : index
    %c0_84 = arith.constant 0 : index
    %114 = vector.load %arg9[%c2_82, %c0_83, %c0_84] : memref<4x16x32xf32, #tpu.memory_space<vmem>>, vector<1x16x32xf32>
    %115 = vector.shape_cast %114 : vector<1x16x32xf32> to vector<16x32xf32>
    %116 = vector.shape_cast %113 : vector<16x32xf32> to vector<1x16x32xf32>
    tpu.vector_store %arg9[%c2_82, %c0_83, %c0_84], %116 {strides = array<i32>} : memref<4x16x32xf32, #tpu.memory_space<vmem>>, vector<1x16x32xf32>,
    %c2_85 = arith.constant 2 : index
    %c0_86 = arith.constant 0 : index
    %c0_87 = arith.constant 0 : index
    %117 = vector.load %arg7[%c2_85, %c0_86, %c0_87] : memref<4x16x1xf32, #tpu.memory_space<vmem>>, vector<1x16x1xf32>
    %118 = vector.shape_cast %117 : vector<1x16x1xf32> to vector<16x1xf32>
    %119 = vector.shape_cast %92 : vector<16x1xf32> to vector<1x16x1xf32>
    tpu.vector_store %arg7[%c2_85, %c0_86, %c0_87], %119 {strides = array<i32>} : memref<4x16x1xf32, #tpu.memory_space<vmem>>, vector<1x16x1xf32>,
    %c0_88 = arith.constant 0 : index
    %c0_89 = arith.constant 0 : index
    %c96 = arith.constant 96 : index
    %120 = vector.load %arg3[%c0_88, %c0_89, %c96] : memref<1x16x128xbf16, #tpu.memory_space<vmem>>, vector<1x16x32xbf16>
    %121 = vector.shape_cast %120 : vector<1x16x32xbf16> to vector<16x32xbf16>
    %c0_90 = arith.constant 0 : index
    %c0_91 = arith.constant 0 : index
    %c96_92 = arith.constant 96 : index
    %122 = vector.load %arg4[%c0_90, %c0_91, %c96_92] : memref<1x16x128xbf16, #tpu.memory_space<vmem>>, vector<1x16x32xbf16>
    %123 = vector.shape_cast %122 : vector<1x16x32xbf16> to vector<16x32xbf16>
    %c0_93 = arith.constant 0 : index
    %c0_94 = arith.constant 0 : index
    %c96_95 = arith.constant 96 : index
    %124 = vector.load %arg5[%c0_93, %c0_94, %c96_95] : memref<1x16x128xbf16, #tpu.memory_space<vmem>>, vector<1x16x32xbf16>
    %125 = vector.shape_cast %124 : vector<1x16x32xbf16> to vector<16x32xbf16>
    %cst_96 = arith.constant dense<0.000000e+00> : vector<16x16xf32>
    %126 = tpu.matmul %121, %123, %cst_96 {dimension_numbers = #tpu.dot_dimension_numbers<[1], [1], [0], [0], [0, 0, 1, 0], [], []>} : vector<16x32xbf16>, vector<16x32xbf16>, vector<16x16xf32> -> vector<16x16xf32>
    %c3 = arith.constant 3 : index
    %c0_97 = arith.constant 0 : index
    %c0_98 = arith.constant 0 : index
    %127 = vector.load %arg7[%c3, %c0_97, %c0_98] : memref<4x16x1xf32, #tpu.memory_space<vmem>>, vector<1x16x1xf32>
    %128 = vector.shape_cast %127 : vector<1x16x1xf32> to vector<16x1xf32>
    %cst_99 = arith.constant dense<0xFF800000> : vector<16xf32>
    %129 = vector.multi_reduction <maximumf>, %126, %cst_99 [1] : vector<16x16xf32> to vector<16xf32>
    %130 = vector.shape_cast %129 : vector<16xf32> to vector<16x1xf32>
    %131 = arith.maximumf %128, %130 : vector<16x1xf32>
    %132 = arith.subf %128, %131 : vector<16x1xf32>
    %133 = math.exp %132 : vector<16x1xf32>
    %134 = vector.broadcast %131 : vector<16x1xf32> to vector<16x16xf32>
    %135 = arith.subf %126, %134 : vector<16x16xf32>
    %136 = math.exp %135 : vector<16x16xf32>
    %c3_100 = arith.constant 3 : index
    %c0_101 = arith.constant 0 : index
    %c0_102 = arith.constant 0 : index
    %137 = vector.load %arg8[%c3_100, %c0_101, %c0_102] : memref<4x16x1xf32, #tpu.memory_space<vmem>>, vector<1x16x1xf32>
    %138 = vector.shape_cast %137 : vector<1x16x1xf32> to vector<16x1xf32>
    %139 = arith.mulf %133, %138 : vector<16x1xf32>
    %cst_103 = arith.constant dense<0.000000e+00> : vector<16xf32>
    %140 = vector.multi_reduction <add>, %136, %cst_103 [1] : vector<16x16xf32> to vector<16xf32>
    %141 = vector.shape_cast %140 : vector<16xf32> to vector<16x1xf32>
    %142 = arith.addf %139, %141 : vector<16x1xf32>
    %c3_104 = arith.constant 3 : index
    %c0_105 = arith.constant 0 : index
    %c0_106 = arith.constant 0 : index
    %143 = vector.load %arg8[%c3_104, %c0_105, %c0_106] : memref<4x16x1xf32, #tpu.memory_space<vmem>>, vector<1x16x1xf32>
    %144 = vector.shape_cast %143 : vector<1x16x1xf32> to vector<16x1xf32>
    %145 = vector.shape_cast %142 : vector<16x1xf32> to vector<1x16x1xf32>
    tpu.vector_store %arg8[%c3_104, %c0_105, %c0_106], %145 {strides = array<i32>} : memref<4x16x1xf32, #tpu.memory_space<vmem>>, vector<1x16x1xf32>,
    %c3_107 = arith.constant 3 : index
    %c0_108 = arith.constant 0 : index
    %c0_109 = arith.constant 0 : index
    %146 = vector.load %arg9[%c3_107, %c0_108, %c0_109] : memref<4x16x32xf32, #tpu.memory_space<vmem>>, vector<1x16x32xf32>
    %147 = vector.shape_cast %146 : vector<1x16x32xf32> to vector<16x32xf32>
    %148 = vector.broadcast %133 : vector<16x1xf32> to vector<16x32xf32>
    %149 = arith.mulf %148, %147 : vector<16x32xf32>
    %150 = arith.truncf %136 : vector<16x16xf32> to vector<16x16xbf16>
    %cst_110 = arith.constant dense<0.000000e+00> : vector<16x32xf32>
    %151 = tpu.matmul %150, %125, %cst_110 {dimension_numbers = #tpu.dot_dimension_numbers<[1], [0], [0], [1], [0, 0, 1, 1], [], []>} : vector<16x16xbf16>, vector<16x32xbf16>, vector<16x32xf32> -> vector<16x32xf32>
    %152 = arith.addf %149, %151 : vector<16x32xf32>
    %c3_111 = arith.constant 3 : index
    %c0_112 = arith.constant 0 : index
    %c0_113 = arith.constant 0 : index
    %153 = vector.load %arg9[%c3_111, %c0_112, %c0_113] : memref<4x16x32xf32, #tpu.memory_space<vmem>>, vector<1x16x32xf32>
    %154 = vector.shape_cast %153 : vector<1x16x32xf32> to vector<16x32xf32>
    %155 = vector.shape_cast %152 : vector<16x32xf32> to vector<1x16x32xf32>
    tpu.vector_store %arg9[%c3_111, %c0_112, %c0_113], %155 {strides = array<i32>} : memref<4x16x32xf32, #tpu.memory_space<vmem>>, vector<1x16x32xf32>,
    %c3_114 = arith.constant 3 : index
    %c0_115 = arith.constant 0 : index
    %c0_116 = arith.constant 0 : index
    %156 = vector.load %arg7[%c3_114, %c0_115, %c0_116] : memref<4x16x1xf32, #tpu.memory_space<vmem>>, vector<1x16x1xf32>
    %157 = vector.shape_cast %156 : vector<1x16x1xf32> to vector<16x1xf32>
    %158 = vector.shape_cast %131 : vector<16x1xf32> to vector<1x16x1xf32>
    tpu.vector_store %arg7[%c3_114, %c0_115, %c0_116], %158 {strides = array<i32>} : memref<4x16x1xf32, #tpu.memory_space<vmem>>, vector<1x16x1xf32>,
    %c0_i32_117 = arith.constant 0 : i32
    %159 = arith.cmpi eq, %arg2, %c0_i32_117 : i32
    %160 = arith.extui %159 : i1 to i32
    %c0_i32_118 = arith.constant 0 : i32
    %161 = arith.cmpi ne, %160, %c0_i32_118 : i32
    scf.if %161 {
      %c0_119 = arith.constant 0 : index
      %c0_120 = arith.constant 0 : index
      %c0_121 = arith.constant 0 : index
      %162 = vector.load %arg9[%c0_119, %c0_120, %c0_121] : memref<4x16x32xf32, #tpu.memory_space<vmem>>, vector<1x16x32xf32>
      %163 = vector.shape_cast %162 : vector<1x16x32xf32> to vector<16x32xf32>
      %c0_122 = arith.constant 0 : index
      %c0_123 = arith.constant 0 : index
      %c0_124 = arith.constant 0 : index
      %164 = vector.load %arg8[%c0_122, %c0_123, %c0_124] : memref<4x16x1xf32, #tpu.memory_space<vmem>>, vector<1x16x1xf32>
      %165 = vector.shape_cast %164 : vector<1x16x1xf32> to vector<16x1xf32>
      %166 = tpu.reciprocal %165 {approx = true} : vector<16x1xf32> -> vector<16x1xf32>
      %167 = vector.broadcast %166 : vector<16x1xf32> to vector<16x32xf32>
      %168 = arith.mulf %163, %167 : vector<16x32xf32>
      %169 = arith.truncf %168 : vector<16x32xf32> to vector<16x32xbf16>
      %c0_125 = arith.constant 0 : index
      %c0_126 = arith.constant 0 : index
      %c0_127 = arith.constant 0 : index
      %170 = vector.load %arg6[%c0_125, %c0_126, %c0_127] : memref<1x16x128xbf16, #tpu.memory_space<vmem>>, vector<1x16x32xbf16>
      %171 = vector.shape_cast %170 : vector<1x16x32xbf16> to vector<16x32xbf16>
      %172 = vector.shape_cast %169 : vector<16x32xbf16> to vector<1x16x32xbf16>
      tpu.vector_store %arg6[%c0_125, %c0_126, %c0_127], %172 {strides = array<i32>} : memref<1x16x128xbf16, #tpu.memory_space<vmem>>, vector<1x16x32xbf16>,
      %c1_128 = arith.constant 1 : index
      %c0_129 = arith.constant 0 : index
      %c0_130 = arith.constant 0 : index
      %173 = vector.load %arg9[%c1_128, %c0_129, %c0_130] : memref<4x16x32xf32, #tpu.memory_space<vmem>>, vector<1x16x32xf32>
      %174 = vector.shape_cast %173 : vector<1x16x32xf32> to vector<16x32xf32>
      %c1_131 = arith.constant 1 : index
      %c0_132 = arith.constant 0 : index
      %c0_133 = arith.constant 0 : index
      %175 = vector.load %arg8[%c1_131, %c0_132, %c0_133] : memref<4x16x1xf32, #tpu.memory_space<vmem>>, vector<1x16x1xf32>
      %176 = vector.shape_cast %175 : vector<1x16x1xf32> to vector<16x1xf32>
      %177 = tpu.reciprocal %176 {approx = true} : vector<16x1xf32> -> vector<16x1xf32>
      %178 = vector.broadcast %177 : vector<16x1xf32> to vector<16x32xf32>
      %179 = arith.mulf %174, %178 : vector<16x32xf32>
      %180 = arith.truncf %179 : vector<16x32xf32> to vector<16x32xbf16>
      %c0_134 = arith.constant 0 : index
      %c0_135 = arith.constant 0 : index
      %c32_136 = arith.constant 32 : index
      %181 = vector.load %arg6[%c0_134, %c0_135, %c32_136] : memref<1x16x128xbf16, #tpu.memory_space<vmem>>, vector<1x16x32xbf16>
      %182 = vector.shape_cast %181 : vector<1x16x32xbf16> to vector<16x32xbf16>
      %183 = vector.shape_cast %180 : vector<16x32xbf16> to vector<1x16x32xbf16>
      tpu.vector_store %arg6[%c0_134, %c0_135, %c32_136], %183 {strides = array<i32>} : memref<1x16x128xbf16, #tpu.memory_space<vmem>>, vector<1x16x32xbf16>,
      %c2_137 = arith.constant 2 : index
      %c0_138 = arith.constant 0 : index
      %c0_139 = arith.constant 0 : index
      %184 = vector.load %arg9[%c2_137, %c0_138, %c0_139] : memref<4x16x32xf32, #tpu.memory_space<vmem>>, vector<1x16x32xf32>
      %185 = vector.shape_cast %184 : vector<1x16x32xf32> to vector<16x32xf32>
      %c2_140 = arith.constant 2 : index
      %c0_141 = arith.constant 0 : index
      %c0_142 = arith.constant 0 : index
      %186 = vector.load %arg8[%c2_140, %c0_141, %c0_142] : memref<4x16x1xf32, #tpu.memory_space<vmem>>, vector<1x16x1xf32>
      %187 = vector.shape_cast %186 : vector<1x16x1xf32> to vector<16x1xf32>
      %188 = tpu.reciprocal %187 {approx = true} : vector<16x1xf32> -> vector<16x1xf32>
      %189 = vector.broadcast %188 : vector<16x1xf32> to vector<16x32xf32>
      %190 = arith.mulf %185, %189 : vector<16x32xf32>
      %191 = arith.truncf %190 : vector<16x32xf32> to vector<16x32xbf16>
      %c0_143 = arith.constant 0 : index
      %c0_144 = arith.constant 0 : index
      %c64_145 = arith.constant 64 : index
      %192 = vector.load %arg6[%c0_143, %c0_144, %c64_145] : memref<1x16x128xbf16, #tpu.memory_space<vmem>>, vector<1x16x32xbf16>
      %193 = vector.shape_cast %192 : vector<1x16x32xbf16> to vector<16x32xbf16>
      %194 = vector.shape_cast %191 : vector<16x32xbf16> to vector<1x16x32xbf16>
      tpu.vector_store %arg6[%c0_143, %c0_144, %c64_145], %194 {strides = array<i32>} : memref<1x16x128xbf16, #tpu.memory_space<vmem>>, vector<1x16x32xbf16>,
      %c3_146 = arith.constant 3 : index
      %c0_147 = arith.constant 0 : index
      %c0_148 = arith.constant 0 : index
      %195 = vector.load %arg9[%c3_146, %c0_147, %c0_148] : memref<4x16x32xf32, #tpu.memory_space<vmem>>, vector<1x16x32xf32>
      %196 = vector.shape_cast %195 : vector<1x16x32xf32> to vector<16x32xf32>
      %c3_149 = arith.constant 3 : index
      %c0_150 = arith.constant 0 : index
      %c0_151 = arith.constant 0 : index
      %197 = vector.load %arg8[%c3_149, %c0_150, %c0_151] : memref<4x16x1xf32, #tpu.memory_space<vmem>>, vector<1x16x1xf32>
      %198 = vector.shape_cast %197 : vector<1x16x1xf32> to vector<16x1xf32>
      %199 = tpu.reciprocal %198 {approx = true} : vector<16x1xf32> -> vector<16x1xf32>
      %200 = vector.broadcast %199 : vector<16x1xf32> to vector<16x32xf32>
      %201 = arith.mulf %196, %200 : vector<16x32xf32>
      %202 = arith.truncf %201 : vector<16x32xf32> to vector<16x32xbf16>
      %c0_152 = arith.constant 0 : index
      %c0_153 = arith.constant 0 : index
      %c96_154 = arith.constant 96 : index
      %203 = vector.load %arg6[%c0_152, %c0_153, %c96_154] : memref<1x16x128xbf16, #tpu.memory_space<vmem>>, vector<1x16x32xbf16>
      %204 = vector.shape_cast %203 : vector<1x16x32xbf16> to vector<16x32xbf16>
      %205 = vector.shape_cast %202 : vector<16x32xbf16> to vector<1x16x32xbf16>
      tpu.vector_store %arg6[%c0_152, %c0_153, %c96_154], %205 {strides = array<i32>} : memref<1x16x128xbf16, #tpu.memory_space<vmem>>, vector<1x16x32xbf16>,
    } else {
    }
    return
  }
  func.func @transform_0(%arg0: i32, %arg1: i32, %arg2: i32) -> (i32, i32, i32) {
    %c0_i32 = arith.constant 0 : i32
    %c0_i32_0 = arith.constant 0 : i32
    return %arg0, %arg1, %c0_i32 : i32, i32, i32
  }
  func.func @transform_1(%arg0: i32, %arg1: i32, %arg2: i32) -> (i32, i32, i32) {
    %c1_i32 = arith.constant 1 : i32
    %c0_i32 = arith.constant 0 : i32
    return %arg0, %arg2, %c1_i32 : i32, i32, i32
  }
  func.func @transform_2(%arg0: i32, %arg1: i32, %arg2: i32) -> (i32, i32, i32) {
    %c2_i32 = arith.constant 2 : i32
    %c0_i32 = arith.constant 0 : i32
    return %arg0, %arg2, %c2_i32 : i32, i32, i32
  }
  func.func @transform_3(%arg0: i32, %arg1: i32, %arg2: i32) -> (i32, i32, i32) {
    %c0_i32 = arith.constant 0 : i32
    %c0_i32_0 = arith.constant 0 : i32
    return %arg0, %arg1, %c0_i32 : i32, i32, i32
  }
}

</mosaic_0001>

<bundles_post_ra>
// kernel: attention_forward.5
= control target key start
LH: loop header
LB: loop body
LE: loop exit
PB: predicated region body
PF: predicated region fallthrough
CT: control target
= control target key end

     0   :  { %s349_s0 = inlined_call_operand.vmem [shape: bf16[32,128], index: 0, kind: input, shape index: {}]   ;;  %s350_s1 = inlined_call_operand.vmem [shape: bf16[128,128], index: 1, kind: input, shape index: {}]   ;;  %s351_s2 = inlined_call_operand.vmem [shape: f32[1,128], index: 2, kind: input, shape index: {}]   ;;  %s352_s3 = inlined_call_operand.hbm [shape: f32[32,128], index: 3, kind: output, shape index: {}]  }
   0x1   :  { %v247_v0 = vld [vmem:[%s350_s1] sm:$0xff]   ;;  %v248_v1 = vld [vmem:[%s350_s1 + $0x8] sm:$0xff]   ;;  %v249_v2 = vld [vmem:[%s350_s1 + $0x10] sm:$0xff]  }
   0x2   :  { %224 = vmatprep.subr.bf16.mxu0 %v247_v0  ;;  %v250_v3 = vld [vmem:[%s350_s1 + $0x18] sm:$0xff]   ;;  %v255_v4 = vld [vmem:[%s349_s0] sm:$0xff]  }
   0x3   :  { %225 = vmatpush3.bf16.msra.mxu0 %v247_v0  ;;  %240 = vmatprep.mubr.bf16.mxu0 %v255_v4 }
   0x4   :  { %226 = vmatprep.subr.bf16.mxu0 %v248_v1 }
   0x7   :  { %227 = vmatpush3.bf16.msra.mxu0 %v248_v1 }
   0x8   :  { %228 = vmatprep.subr.bf16.mxu0 %v249_v2 }
   0x9   :  { %8 = vsyncpa [#allocation4], 0  ;;  %v251_v5 = vld [vmem:[%s350_s1 + $0x20] sm:$0xff]   ;;  %v252_v6 = vld [vmem:[%s350_s1 + $0x28] sm:$0xff]   ;;  %s281_s7 = smov [#allocation3]  }
   0xa   :  { %v253_v7 = vld [vmem:[%s350_s1 + $0x30] sm:$0xff]   ;;  %v254_v8 = vld [vmem:[%s350_s1 + $0x38] sm:$0xff]   ;;  %v256_v9 = vld [vmem:[%s349_s0 + $0x8] sm:$0xff]   ;;  %s192_s8 = sshll.u32 %s281_s7, 4  ;;  %s193_s8 = int_to_ptr.vmem [resolvable:$true] %s192_s8 }
   0xb   :  { %229 = vmatpush3.bf16.msra.mxu0 %v249_v2  ;;  %v213_v10 = vld [vmem:[%s351_s2] ss:$0 sm:$0xff]  ;;  %s257_s0 = scalar_lea.vmem %s193_s8, 512  ;;  %p262_p1 = scmp.lt.s32.totalorder %s193_s8, %s193_s8 }
   0xc   :  { %230 = vmatprep.subr.bf16.mxu0 %v250_v3  ;;  %p258_p0 = scmp.ne.s32.totalorder %s193_s8, %s257_s0  ;;  %p263_p2 = scmp.lt.s32.totalorder %s257_s0, %s257_s0 }
   0xe   :  { %p264_p3 = por %p263_p2, %p262_p1 }
   0xf   :  { %231 = vmatpush3.bf16.msra.mxu0 %v250_v3 }
  0x10   :  { %232 = vmatprep.subr.bf16.mxu0 %v251_v5  ;;  %p265_p4 = pnand %p264_p3, %p258_p0 }
  0x13   :  { %233 = vmatpush3.bf16.msra.mxu0 %v251_v5 }
  0x14   :  { %234 = vmatprep.subr.bf16.mxu0 %v252_v6 }
  0x17   :  { %235 = vmatpush3.bf16.msra.mxu0 %v252_v6 }
  0x18   :  { %236 = vmatprep.subr.bf16.mxu0 %v253_v7 }
  0x1b   :  { %237 = vmatpush3.bf16.msra.mxu0 %v253_v7 }
  0x1c   :  { %238 = vmatprep.subr.bf16.mxu0 %v254_v8 }
  0x1f   :  { %239 = vmatpush3.bf16.msra.mxu0 %v254_v8 }
  0x22   :  { %241 = vmatmul.mubr.bf16.vlgmr.msra.gmra.mrb[0].mxu0 %v256_v9 }
  0xf5   :  { %v242_v11 = vpop.f32.mrb[0].mxu0 }
  0xf6   :  { %v181_v12 = vadd.f32 %v242_v11, %v213_v10  ;;  %v142_v13 = vpop.f32.mrb[1].mxu0 }
  0xf7   :  { %v179_v14 = vadd.f32 %v213_v10, %v142_v13  ;;  %v243_v15 = vpop.f32.mrb[2].mxu0 }
  0xf8   :  { %185 = vst [vmem:[#allocation3 + $0x10] sm:$0xff] %v181_v12  ;;  %v182_v16 = vadd.f32 %v243_v15, %v213_v10  ;;  %v145_v17 = vpop.f32.mrb[3].mxu0 }
  0xf9   :  { %183 = vst [vmem:[#allocation3] sm:$0xff] %v179_v14  ;;  %v180_v18 = vadd.f32 %v213_v10, %v145_v17 }
  0xfa   :  { %186 = vst [vmem:[#allocation3 + $0x18] sm:$0xff] %v182_v16 }
  0xfb   :  { %184 = vst [vmem:[#allocation3 + $0x8] sm:$0xff] %v180_v18 }
  0xfc   :  { %268 = shalt.err (!%p265_p4)
}
  0xfd   :  { %s269_s9 = scalar_lea.hbm %s352_s3, 512 }
  0xfe   :  { %p270_p5 = scmp.ne.s32.totalorder %s352_s3, %s269_s9  ;;  %p273_p6 = scmp.lt.u32.totalorder %s269_s9, %s352_s3 }
 0x100   :  { %p275_p7 = pnand %p273_p6, %p270_p5 }
 0x102   :  { %278 = shalt.err (!%p275_p7)
}
 0x103   :  { %s282_s14 = smov 128   ;;  %s283_s15 = smov 8  }
 0x104   :  { %198 = dma.vmem_to_hbm [thread:$0]  %s193_s8, 512, %s352_s3, [#allocation4], %s282_s14, %s282_s14, %s283_s15  }
 0x105   :  { %279 = dma.done.wait [#allocation4], 512  }
 0x106   :  { %280 = vsyncadd [#allocation4], 4294966784 }
 0x107   :  { %202 = vsyncpa [#allocation4], 1 }

// kernel: attention_forward.3
= control target key start
LH: loop header
LB: loop body
LE: loop exit
PB: predicated region body
PF: predicated region fallthrough
CT: control target
= control target key end

     0   :  { %7 = vsyncpa [#allocation4], 0  ;;  %s658_s0 = inlined_call_operand.hbm [shape: f32[32,128], index: 0, kind: input, shape index: {}]   ;;  %s659_s1 = inlined_call_operand.hbm [shape: bf16[128,384], index: 1, kind: input, shape index: {}]   ;;  %s660_s2 = inlined_call_operand.vmem [shape: bf16[32,384], index: 2, kind: output, shape index: {}]  }
   0x1   :  { %8 = vsyncpa [#allocation6], 0  ;;  %s586_s9 = smov [#allocation3]   ;;  %s538_s13 = scalar_lea.hbm %s658_s0, 512 }
   0x2   :  { %s14_s10 = sshll.u32 %s586_s9, 4  ;;  %p539_p0 = scmp.ne.s32.totalorder %s658_s0, %s538_s13  ;;  %s15_s10 = int_to_ptr.vmem [resolvable:$true] %s14_s10 }
   0x3   :  { %p542_p1 = scmp.lt.u32.totalorder %s538_s13, %s658_s0 }
   0x5   :  { %p544_p2 = pnand %p542_p1, %p539_p0 }
   0x7   :  { %547 = shalt.err (!%p544_p2)
}
   0x8   :  { %s548_s18 = scalar_lea.vmem %s15_s10, 512  ;;  %p553_p4 = scmp.lt.s32.totalorder %s15_s10, %s15_s10 }
   0x9   :  { %p549_p3 = scmp.ne.s32.totalorder %s15_s10, %s548_s18  ;;  %p554_p5 = scmp.lt.s32.totalorder %s548_s18, %s548_s18 }
   0xb   :  { %p555_p6 = por %p554_p5, %p553_p4 }
   0xd   :  { %p556_p7 = pnand %p555_p6, %p549_p3 }
   0xf   :  { %559 = shalt.err (!%p556_p7)
}
  0x10   :  { %s587_s19 = smov 128   ;;  %s588_s20 = smov 8  }
  0x11   :  { %20 = dma.hbm_to_vmem [thread:$0]  %s658_s0, 512, %s15_s10, [#allocation4], %s587_s19, %s587_s19, %s588_s20  }
  0x12   :  { %s589_s23 = smov [#allocation5]   ;;  %s560_s27 = scalar_lea.hbm %s659_s1, 3072 }
  0x13   :  { %s26_s24 = sshll.u32 %s589_s23, 4  ;;  %p561_p8 = scmp.ne.s32.totalorder %s659_s1, %s560_s27  ;;  %s27_s24 = int_to_ptr.vmem [resolvable:$true] %s26_s24 }
  0x14   :  { %p564_p9 = scmp.lt.u32.totalorder %s560_s27, %s659_s1 }
  0x16   :  { %p566_p10 = pnand %p564_p9, %p561_p8 }
  0x18   :  { %569 = shalt.err (!%p566_p10)
}
  0x19   :  { %s570_s4 = scalar_lea.vmem %s27_s24, 3072  ;;  %p575_p12 = scmp.lt.s32.totalorder %s27_s24, %s27_s24 }
  0x1a   :  { %p571_p11 = scmp.ne.s32.totalorder %s27_s24, %s570_s4  ;;  %p576_p13 = scmp.lt.s32.totalorder %s570_s4, %s570_s4 }
  0x1c   :  { %p577_p0 = por %p576_p13, %p575_p12 }
  0x1e   :  { %p578_p1 = pnand %p577_p0, %p571_p11 }
  0x20   :  { %581 = shalt.err (!%p578_p1)
}
  0x21   :  { %s590_s0 = smov 192   ;;  %s591_s5 = smov 12  }
  0x22   :  { %32 = dma.hbm_to_vmem [thread:$0]  %s659_s1, 3072, %s27_s24, [#allocation6], %s590_s0, %s590_s0, %s591_s5  }
  0x23   :  { %582 = dma.done.wait [#allocation4], 512  }
  0x24   :  { %583 = vsyncadd [#allocation4], 4294966784 }
  0x25   :  { %584 = dma.done.wait [#allocation6], 3072  }
  0x26   :  { %585 = vsyncadd [#allocation6], 4294964224  ;;  %v592_v0 = vmov 0   ;;  %v506_v1 = vld [vmem:[#allocation5 + $0x4] ss:$12 sps:$4 sm:$0xff]   ;;  %v69_v18 = vld [vmem:[#allocation3 + $0x8] sm:$0xff] }
  0x27   :  { %266 = vmatprep.mubr.bf16.mxu0 %v592_v0  ;;  %v508_v2 = vld [vmem:[#allocation5] ss:$12 sps:$4 sm:$0xff]   ;;  %234 = vmatprep.subr.bf16.mxu0 %v506_v1  ;;  %v509_v3 = vld [vmem:[#allocation5 + $0x1c] ss:$12 sps:$4 sm:$0xff]   ;;  %v511_v4 = vld [vmem:[#allocation5 + $0x18] ss:$12 sps:$4 sm:$0xff]  }
  0x28   :  { %235 = vmatpush1.bf16.msra.mxu0 %v508_v2  ;;  %v512_v5 = vld [vmem:[#allocation5 + $0x8] ss:$12 sps:$4 sm:$0xff]   ;;  %v516_v7 = vld [vmem:[#allocation5 + $0x20] ss:$12 sps:$4 sm:$0xff]   ;;  %v515_v8 = vld [vmem:[#allocation5 + $0x30] ss:$12 sps:$4 sm:$0xff]  }
  0x29   :  { %236 = vmatprep.subr.bf16.mxu0 %v509_v3  ;;  %v513_v6 = vld [vmem:[#allocation5 + $0x34] ss:$12 sps:$4 sm:$0xff]   ;;  %479 = vmatprep.subr.bf16.mxu1 %v512_v5  ;;  %v517_v9 = vld [vmem:[#allocation5 + $0x4c] ss:$12 sps:$4 sm:$0xff]   ;;  %v524_v12 = vld [vmem:[#allocation5 + $0x50] ss:$12 sps:$4 sm:$0xff]  }
  0x2a   :  { %480 = vmatpush3.bf16.msra.mxu1 %v512_v5  ;;  %v520_v10 = vld [vmem:[#allocation5 + $0x38] ss:$12 sps:$4 sm:$0xff]   ;;  %v519_v11 = vld [vmem:[#allocation5 + $0x48] ss:$12 sps:$4 sm:$0xff]   ;;  %v523_v14 = vld [vmem:[#allocation5 + $0x60] ss:$12 sps:$4 sm:$0xff]  }
  0x2b   :  { %481 = vmatprep.subr.bf16.mxu1 %v516_v7  ;;  %v521_v13 = vld [vmem:[#allocation5 + $0x64] ss:$12 sps:$4 sm:$0xff]   ;;  %v528_v15 = vld [vmem:[#allocation5 + $0x68] ss:$12 sps:$4 sm:$0xff]   ;;  %v532_v20 = vld [vmem:[#allocation5 + $0x80] ss:$12 sps:$4 sm:$0xff]  }
  0x2c   :  { %237 = vmatpush1.bf16.msra.mxu0 %v511_v4  ;;  %v525_v16 = vld [vmem:[#allocation5 + $0x7c] ss:$12 sps:$4 sm:$0xff]   ;;  %v68_v17 = vld [vmem:[#allocation3] sm:$0xff]  ;;  %v533_v25 = vld [vmem:[#allocation5 + $0xac] ss:$12 sps:$4 sm:$0xff]  }
  0x2d   :  { %238 = vmatprep.subr.bf16.mxu0 %v513_v6  ;;  %v527_v19 = vld [vmem:[#allocation5 + $0x78] ss:$12 sps:$4 sm:$0xff]   ;;  %v72_v21 = vpack.c.bf16 %v69_v18, %v68_v17  ;;  %v529_v22 = vld [vmem:[#allocation5 + $0x94] ss:$12 sps:$4 sm:$0xff]   ;;  %v531_v23 = vld [vmem:[#allocation5 + $0x90] ss:$12 sps:$4 sm:$0xff]  }
  0x2e   :  { %482 = vmatpush3.bf16.msra.mxu1 %v516_v7  ;;  %v536_v24 = vld [vmem:[#allocation5 + $0x98] ss:$12 sps:$4 sm:$0xff]   ;;  %v535_v26 = vld [vmem:[#allocation5 + $0xa8] ss:$12 sps:$4 sm:$0xff]   ;;  %v537_v27 = vld [vmem:[#allocation5 + $0xb0] ss:$12 sps:$4 sm:$0xff]  }
  0x2f   :  { %483 = vmatprep.subr.bf16.mxu1 %v520_v10  ;;  %495 = vmatprep.mubr.bf16.mxu1 %v72_v21  ;;  %v70_v28 = vld [vmem:[#allocation3 + $0x10] sm:$0xff]  ;;  %v71_v29 = vld [vmem:[#allocation3 + $0x18] sm:$0xff] }
  0x30   :  { %239 = vmatpush1.bf16.msra.mxu0 %v515_v8  ;;  %v73_v30 = vpack.c.bf16 %v71_v29, %v70_v28 }
  0x31   :  { %240 = vmatprep.subr.bf16.mxu0 %v517_v9 }
  0x32   :  { %484 = vmatpush3.bf16.msra.mxu1 %v520_v10 }
  0x33   :  { %485 = vmatprep.subr.bf16.mxu1 %v524_v12 }
  0x34   :  { %241 = vmatpush1.bf16.msra.mxu0 %v519_v11 }
  0x35   :  { %242 = vmatprep.subr.bf16.mxu0 %v521_v13 }
  0x36   :  { %486 = vmatpush3.bf16.msra.mxu1 %v524_v12 }
  0x37   :  { %487 = vmatprep.subr.bf16.mxu1 %v528_v15 }
  0x38   :  { %243 = vmatpush1.bf16.msra.mxu0 %v523_v14 }
  0x39   :  { %244 = vmatprep.subr.bf16.mxu0 %v525_v16 }
  0x3a   :  { %488 = vmatpush3.bf16.msra.mxu1 %v528_v15 }
  0x3b   :  { %489 = vmatprep.subr.bf16.mxu1 %v532_v20 }
  0x3c   :  { %245 = vmatpush1.bf16.msra.mxu0 %v527_v19 }
  0x3d   :  { %246 = vmatprep.subr.bf16.mxu0 %v529_v22 }
  0x3e   :  { %490 = vmatpush3.bf16.msra.mxu1 %v532_v20 }
  0x3f   :  { %491 = vmatprep.subr.bf16.mxu1 %v536_v24 }
  0x40   :  { %247 = vmatpush1.bf16.msra.mxu0 %v531_v23 }
  0x41   :  { %248 = vmatprep.subr.bf16.mxu0 %v533_v25 }
  0x42   :  { %492 = vmatpush3.bf16.msra.mxu1 %v536_v24 }
  0x43   :  { %493 = vmatprep.subr.bf16.mxu1 %v537_v27 }
  0x44   :  { %249 = vmatpush1.bf16.msra.mxu0 %v535_v26 }
  0x46   :  { %494 = vmatpush3.bf16.msra.mxu1 %v537_v27 }
  0x47   :  { %267 = vmatmul.mubr.bf16.vlgmr.msra.gmra.mrb[0].mxu0 %v72_v21 }
  0x48   :  { %276 = vmatprep.mubr.bf16.mxu0 %v592_v0 }
  0x49   :  { %496 = vmatmul.mubr.bf16.vlgmr.msra.gmra.mrb[0].mxu1 %v73_v30 }
  0x4f   :  { %277 = vmatmul.mubr.bf16.gmra.mrb[4].mxu0 %v73_v30 }
 0x11a   :  { %v268_v31 = vpop.f32.mrb[0].mxu0 }
 0x11b   :  { %v270_v32 = vpop.f32.mrb[1].mxu0 }
 0x11c   :  { %v461_v33 = vpack.c.bf16 %v270_v32, %v268_v31  ;;  %v272_v34 = vpop.f32.mrb[2].mxu0  ;;  %v497_v36 = vpop.f32.mrb[0].mxu1 }
 0x11d   :  { %v274_v35 = vpop.f32.mrb[3].mxu0  ;;  %v466_v38 = vpack.c.bf16 %v497_v36, %v497_v36  ;;  %v321_v39 = vpop.f32.mrb[1].mxu1 }
 0x11e   :  { %415 = vst [vmem:[%s660_s2] sm:$0xff] %v461_v33  ;;  %v463_v37 = vpack.c.bf16 %v274_v35, %v272_v34  ;;  %v462_v40 = vpack.c.bf16 %v321_v39, %v321_v39  ;;  %v498_v41 = vpop.f32.mrb[2].mxu1 }
 0x11f   :  { %420 = vst [vmem:[%s660_s2 + $0x20] sm:$0xf] %v466_v38  ;;  %v468_v42 = vpack.c.bf16 %v498_v41, %v498_v41  ;;  %v324_v43 = vpop.f32.mrb[3].mxu1 }
 0x120   :  { %417 = vst [vmem:[%s660_s2 + $0xc] sm:$0xff] %v463_v37  ;;  %416 = vst [vmem:[%s660_s2 + $0x8] sm:$0xf] %v462_v40  ;;  %v464_v44 = vpack.c.bf16 %v324_v43, %v324_v43 }
 0x121   :  { %422 = vst [vmem:[%s660_s2 + $0x2c] sm:$0xf] %v468_v42 }
 0x122   :  { %v278_v45 = vpop.f32.mrb[4].mxu0  ;;  %418 = vst [vmem:[%s660_s2 + $0x14] sm:$0xf] %v464_v44 }
 0x123   :  { %v280_v46 = vpop.f32.mrb[5].mxu0 }
 0x124   :  { %v465_v47 = vpack.c.bf16 %v280_v46, %v278_v45  ;;  %v282_v48 = vpop.f32.mrb[6].mxu0 }
 0x125   :  { %v284_v49 = vpop.f32.mrb[7].mxu0 }
 0x126   :  { %419 = vst [vmem:[%s660_s2 + $0x18] sm:$0xff] %v465_v47  ;;  %v467_v50 = vpack.c.bf16 %v284_v49, %v282_v48 }
 0x128   :  { %421 = vst [vmem:[%s660_s2 + $0x24] sm:$0xff] %v467_v50 }
 0x129   :  { %427 = vsyncpa [#allocation4], 1 }
 0x12a   :  { %428 = vsyncpa [#allocation6], 1 }

// kernel: attention_forward.4
= control target key start
LH: loop header
LB: loop body
LE: loop exit
PB: predicated region body
PF: predicated region fallthrough
CT: control target
= control target key end

     0   :  { %s1748_s12 = smov 0   ;;  %s1750_s13 = smov 0   ;;  %s2135_s0 = inlined_call_operand.vmem [shape: bf16[2,16,384], index: 0, kind: input, shape index: {}, may-alias: {0,1,2}]   ;;  %s2136_s1 = inlined_call_operand.vmem [shape: bf16[2,16,384], index: 1, kind: input, shape index: {}, may-alias: {0,1,2}]   ;;  %s2137_s2 = inlined_call_operand.vmem [shape: bf16[2,16,384], index: 2, kind: input, shape index: {}, may-alias: {0,1,2}]   ;;  %s2138_s3 = inlined_call_operand.vmem [shape: bf16[2,16,128], index: 3, kind: output, shape index: {}]  }
   0x1   :  { %s1752_s14 = smov 0   ;;  %s1754_s15 = smov 0  }
   0x2   :  { %s1756_s16 = smov 0  }
   0x3 LB: > { %s32_s17 = sadd.s32 1, %s1715_s15  ;;  %p48_p1 = scmp.ne.s32.totalorder %s1707_s13, %s1703_s12  ;;  %s1719_s16 = sphi %s1756_s16, %s13_s16   ;;  %s1715_s15 = sphi %s1754_s15, %s2143_s15   ;;  %s1711_s14 = sphi %s1752_s14, %s2142_s14   ;;  %s1707_s13 = sphi %s1750_s13, %s2141_s13   ;;  %s1703_s12 = sphi %s1748_s12, %s2140_s12  }
   0x4   : > { %p34_p0 = scmp.ge.s32.totalorder %s32_s17, 2  ;;  %p49_p2 = scmp.eq.s32.totalorder %s1719_s16, 0 }
   0x5   : > { %s41_s20 = sadd.s32 1, %s1707_s13  ;;  %p1451_p5 = scmp.ge.s32.totalorder %s1719_s16, 2 }
   0x6   : > { %s2145_s17 = smov (%p34_p0, %s32_s17), 0  ;;  %p1779_p3 = por %p49_p2, %p48_p1 }
   0x7   : > { %s36_s19 = ssub.s32 %s1715_s15, %s2145_s17  ;;  %158 = sbr.rel (%p1451_p5) target bundleno = 35 (0x23), region = 16 }
   0x8   : > { %p39_p4 = scmp.eq.s32.totalorder %s36_s19, 0 }
   0xa   : > { %s1787_s21 = scalar_select %p39_p4, %s1707_s13, %s41_s20  }
   0xe   : > { %161 = sbr.rel (!%p1779_p3) target bundleno = 21 (0x15), region = 20  ;;  %s163_s22 = sand.u32 (%p1779_p3), 1, %s1707_s13  }
   0xf   : > { %s1571_s23 = smul.u32 (%p1779_p3), 24, %s1715_s15  ;;  %s1452_s24 = sshll.u32 (%p1779_p3), %s163_s22, 3 }
  0x10   : > { %s165_s28 = scalar_lea.vmem (%p1779_p3), [#allocation5], %s1452_s24 }
  0x11   : > { %s171_s27 = scalar_lea.vmem (%p1779_p3), %s2135_s0, %s1571_s23 }
  0x12   : > { %v187_v0 = vld [vmem:[%s171_s27] sm:$0xf] (%p1779_p3)  ;;  %v189_v1 = vld [vmem:[%s171_s27 + $0xc] sm:$0xf] (%p1779_p3) }
  0x13   : > { %188 = vst [vmem:[%s165_s28] sm:$0xf] (%p1779_p3), %v187_v0  ;;  %190 = vst [vmem:[%s165_s28 + $0x4] sm:$0xf] (%p1779_p3), %v189_v1 }
  0x15 PF: > { %217 = sbr.rel (!%p1779_p3) target bundleno = 28 (0x1c), region = 61  ;;  %s219_s29 = sand.u32 (%p1779_p3), 1, %s1707_s13  }
  0x16   : > { %s1455_s30 = smul.u32 (%p1779_p3), 24, %s1715_s15  ;;  %s1454_s4 = sshll.u32 (%p1779_p3), %s219_s29, 3 }
  0x17   : > { %s221_s8 = scalar_lea.vmem (%p1779_p3), [#allocation6], %s1454_s4 }
  0x18   : > { %s1354_s7 = scalar_lea.vmem (%p1779_p3), %s2136_s1, %s1455_s30 }
  0x19   : > { %v1456_v2 = vld [vmem:[%s1354_s7 + $0x4] sm:$0xf] (%p1779_p3)  ;;  %v1457_v3 = vld [vmem:[%s1354_s7 + $0x10] sm:$0xf] (%p1779_p3) }
  0x1a   : > { %245 = vst [vmem:[%s221_s8] sm:$0xf] (%p1779_p3), %v1456_v2  ;;  %247 = vst [vmem:[%s221_s8 + $0x4] sm:$0xf] (%p1779_p3), %v1457_v3 }
  0x1c PF: > { %274 = sbr.rel (!%p1779_p3) target bundleno = 35 (0x23), region = 102  ;;  %s276_s9 = sand.u32 (%p1779_p3), 1, %s1707_s13  }
  0x1d   : > { %s1459_s10 = smul.u32 (%p1779_p3), 24, %s1715_s15  ;;  %s1458_s11 = sshll.u32 (%p1779_p3), %s276_s9, 3 }
  0x1e   : > { %s278_s23 = scalar_lea.vmem (%p1779_p3), [#allocation7], %s1458_s11 }
  0x1f   : > { %s1362_s22 = scalar_lea.vmem (%p1779_p3), %s2137_s2, %s1459_s10 }
  0x20   : > { %v1460_v4 = vld [vmem:[%s1362_s22 + $0x8] sm:$0xf] (%p1779_p3)  ;;  %v1461_v5 = vld [vmem:[%s1362_s22 + $0x14] sm:$0xf] (%p1779_p3) }
  0x21   : > { %302 = vst [vmem:[%s278_s23] sm:$0xf] (%p1779_p3), %v1460_v4  ;;  %304 = vst [vmem:[%s278_s23 + $0x4] sm:$0xf] (%p1779_p3), %v1461_v5 }
  0x23 PF: > { %p1462_p6 = scmp.ge.s32.totalorder %s1719_s16, 1  ;;  %p330_p7 = scmp.lt.s32.totalorder %s1719_s16, 3 }
  0x25   : > { %p331_p8 = pnand %p1462_p6, %p330_p7 }
  0x26   : > { %s337_s18 = sand.u32 (!%p331_p8), 1, %s1703_s12   ;;  %vm421_vm0 = vcmask (!%p331_p8), 261120   ;;  %v1721_v6 = vmov (!%p331_p8), 0.0   ;;  %vm1722_vm1 = vmmov (!%p331_p8), 0   ;;  %vm404_vm2 = vcmask (!%p331_p8), 7168   ;;  %s1725_s26 = smov (!%p331_p8), 96  }
  0x27   : > { %334 = sbr.rel (%p331_p8) target bundleno = 1496 (0x5d8), region = 143  ;;  %1523 = vmatprep.subr.bf16.mxu0 (!%p331_p8), %v1721_v6  ;;  %s1815_s24 = sshll.u32 (!%p331_p8), %s337_s18, 3  ;;  %422 = vst.msk [vmem:[#allocation4] sm:$0xff] (!%p331_p8), %vm421_vm0, %v1721_v6  ;;  %423 = vst.msk [vmem:[#allocation4 + $0x8] sm:$0xff] (!%p331_p8), %vm421_vm0, %v1721_v6  ;;  %1525 = vmatprep.mubr.msk.bf16.mxu0 (!%p331_p8), %vm1722_vm1, %v1721_v6  ;;  %v1723_v10 = vmov (!%p331_p8), -inf   ;;  %vm496_vm3 = vcmask (!%p331_p8), 130048  }
  0x28   : > { %424 = vst.msk [vmem:[#allocation4 + $0x10] sm:$0xff] (!%p331_p8), %vm421_vm0, %v1721_v6  ;;  %425 = vst.msk [vmem:[#allocation4 + $0x18] sm:$0xff] (!%p331_p8), %vm421_vm0, %v1721_v6  ;;  %1529 = vmatprep.subr.bf16.mxu1 (!%p331_p8), %v1721_v6  ;;  %1531 = vmatprep.mubr.msk.bf16.mxu1 (!%p331_p8), %vm1722_vm1, %v1721_v6  ;;  %s1839_s12 = scalar_lea.vmem (!%p331_p8), [#allocation6], %s1815_s24  ;;  %s1843_s25 = scalar_lea.vmem (!%p331_p8), [#allocation5], %s1815_s24  ;;  %v1724_v17 = vmov (!%p331_p8), 0   ;;  %vm1209_vm4 = vcmask (!%p331_p8), 257024  }
  0x29   : > { %426 = vst.msk [vmem:[#allocation4 + $0x20] sm:$0xff] (!%p331_p8), %vm421_vm0, %v1721_v6  ;;  %427 = vst.msk [vmem:[#allocation4 + $0x28] sm:$0xff] (!%p331_p8), %vm421_vm0, %v1721_v6  ;;  %v1621_v7 = vld [vmem:[%s1839_s12] sm:$0xff] (!%p331_p8)   ;;  %v1622_v9 = vld [vmem:[%s1843_s25] sm:$0xff] (!%p331_p8)   ;;  %1619 = vset.pattern.permute.xlu1 (!%p331_p8), %v1724_v17  ;;  %1620 = vset.pattern.permute.xlu0 (!%p331_p8), %v1724_v17  ;;  %s1903_s27 = scalar_lea.vmem (!%p331_p8), [#allocation7], %s1815_s24  ;;  %s1726_s28 = smov (!%p331_p8), 64  }
  0x2a   : > { %428 = vst.msk [vmem:[#allocation4 + $0x30] sm:$0xff] (!%p331_p8), %vm421_vm0, %v1721_v6  ;;  %429 = vst.msk [vmem:[#allocation4 + $0x38] sm:$0xff] (!%p331_p8), %vm421_vm0, %v1721_v6  ;;  %v451_v8 = vsel (!%p331_p8), %vm421_vm0, %v1621_v7, 0  ;;  %v1623_v18 = vld [vmem:[%s1839_s12] sm:$0xff] (!%p331_p8)   ;;  %v1624_v27 = vld [vmem:[%s1843_s25] sm:$0xff] (!%p331_p8)   ;;  %s1727_s29 = smov (!%p331_p8), 32  }
  0x2b   : > { %1524 = vmatpush3.bf16.xpose.msra.mxu0 (!%p331_p8), %v451_v8  ;;  %405 = vst.msk [vmem:[#allocation2] sm:$0xff] (!%p331_p8), %vm404_vm2, %v1723_v10  ;;  %406 = vst.msk [vmem:[#allocation2 + $0x8] sm:$0xff] (!%p331_p8), %vm404_vm2, %v1723_v10  ;;  %v1625_v28 = vld [vmem:[%s1839_s12] sm:$0xff] (!%p331_p8)   ;;  %v1629_v29 = vld [vmem:[%s1903_s27] sm:$0xff] (!%p331_p8)   ;;  %p390_p9 = scmp.lt.s32.totalorder (!%p331_p8), %s1711_s14, 1  ;;  %vm1242_vm5 = vcmask (!%p331_p8), 519424  }
  0x2c   : > { %1541 = vmatprep.subr.bf16.mxu0 (!%p331_p8), %v1721_v6  ;;  %407 = vst.msk [vmem:[#allocation2 + $0x10] sm:$0xff] (!%p331_p8), %vm404_vm2, %v1723_v10  ;;  %408 = vst.msk [vmem:[#allocation2 + $0x18] sm:$0xff] (!%p331_p8), %vm404_vm2, %v1723_v10  ;;  %1530 = vmatpush3.bf16.msra.mxu1 (!%p331_p8), %v1629_v29  ;;  %v1626_v30 = vld [vmem:[%s1843_s25] sm:$0xff] (!%p331_p8)   ;;  %v1627_v31 = vld [vmem:[%s1839_s12] sm:$0xff] (!%p331_p8)   ;;  %vm1275_vm6 = vcmask (!%p331_p8), 781824   ;;  %vm1308_vm7 = vcmask (!%p331_p8), 1044224  }
  0x2d   : > { %409 = vst.msk [vmem:[#allocation2 + $0x20] sm:$0xff] (!%p331_p8), %vm404_vm2, %v1723_v10  ;;  %410 = vst.msk [vmem:[#allocation2 + $0x28] sm:$0xff] (!%p331_p8), %vm404_vm2, %v1723_v10  ;;  %1535 = vmatprep.subr.bf16.mxu1 (!%p331_p8), %v1721_v6  ;;  %v1628_v32 = vld [vmem:[%s1843_s25] sm:$0xff] (!%p331_p8)  }
  0x2e   : > { %411 = vst.msk [vmem:[#allocation2 + $0x30] sm:$0xff] %vm404_vm2, %v1723_v10  ;;  %412 = vst.msk [vmem:[#allocation2 + $0x38] sm:$0xff] %vm404_vm2, %v1723_v10  ;;  %v1630_v17 = vld [vmem:[%s1903_s27] sm:$0xff]   ;;  %s2147_s14 = smov (!%p390_p9, %s1711_s14), 1 }
  0x2f   : > { %413 = vst.msk [vmem:[#allocation3] sm:$0xff] %vm404_vm2, %v1721_v6  ;;  %414 = vst.msk [vmem:[#allocation3 + $0x8] sm:$0xff] %vm404_vm2, %v1721_v6  ;;  %s1498_s30 = sshll.u32 %s2147_s14, 3 }
  0x30   : > { %415 = vst.msk [vmem:[#allocation3 + $0x10] sm:$0xff] %vm404_vm2, %v1721_v6  ;;  %416 = vst.msk [vmem:[#allocation3 + $0x18] sm:$0xff] %vm404_vm2, %v1721_v6  ;;  %s2097_s6 = scalar_lea.vmem %s2138_s3, %s1498_s30 }
  0x31   : > { %417 = vst.msk [vmem:[#allocation3 + $0x20] sm:$0xff] %vm404_vm2, %v1721_v6  ;;  %418 = vst.msk [vmem:[#allocation3 + $0x28] sm:$0xff] %vm404_vm2, %v1721_v6 }
  0x32   : > { %1526 = vmatmul.mubr.msk.bf16.vlgmr.msra.gmra.mrb[0].mxu0 %vm421_vm0, %v1622_v9  ;;  %419 = vst.msk [vmem:[#allocation3 + $0x30] sm:$0xff] %vm404_vm2, %v1721_v6  ;;  %420 = vst.msk [vmem:[#allocation3 + $0x38] sm:$0xff] %vm404_vm2, %v1721_v6  ;;  %v1879_v19 = vld [vmem:[#allocation2] sm:$0xff]  ;;  %v1884_v22 = vld [vmem:[#allocation2 + $0x8] sm:$0xff] }
  0x33   : > { %1543 = vmatprep.mubr.msk.bf16.mxu0 %vm1722_vm1, %v1721_v6  ;;  %v1963_v10 = vld [vmem:[#allocation2 + $0x10] sm:$0xff] }
 0x105   : > { %v487_v11 = vpop.f32.mrb[0].mxu0 }
 0x106   : > { %v1527_v12 = vpop.f32.mrb[1].mxu0  ;;  %v497_v13 = vsel %vm496_vm3, %v487_v11, -inf }
 0x107   : > { %498 = vmax.xlane.f32.xlu0 %v497_v13  ;;  %v490_v14 = vpop.f32.mrb[2].mxu0  ;;  %v1965_v12 = vld [vmem:[#allocation2 + $0x18] sm:$0xff] }
 0x108   : > { %v1528_v15 = vpop.f32.mrb[3].mxu0  ;;  %v500_v16 = vsel %vm496_vm3, %v490_v14, -inf }
 0x10b   : > { %501 = vmax.xlane.f32.xlu0 %v500_v16 }
 0x121   : > { %631 = vrot.lane.b32.xlu0 %v1623_v18, %s1725_s26 }
 0x194   : > { %v499_v20 = vpop.xlane.xlu0 %498 }
 0x195   : > { %v1882_v21 = vmax.f32 %v1879_v19, %v499_v20  ;;  %v1984_v20 = vld [vmem:[#allocation2 + $0x20] sm:$0xff] }
 0x197   : > { %v505_v23 = vsub.f32 %v1879_v19, %v1882_v21  ;;  %611 = vst.msk [vmem:[#allocation2] sm:$0xff] %vm404_vm2, %v1882_v21  ;;  %513 = vperm.xlu1 %1619, %v1882_v21  }
 0x198   : > { %v502_v24 = vpop.xlane.xlu0 %501 }
 0x199   : > { %v1892_v25 = vmax.f32 %v1884_v22, %v502_v24 }
 0x19b   : > { %v506_v26 = vsub.f32 %v1884_v22, %v1892_v25  ;;  %612 = vst.msk [vmem:[#allocation2 + $0x8] sm:$0xff] %vm404_vm2, %v1892_v25  ;;  %518 = vperm.xlu1 %1619, %v1892_v25  }
 0x19c   : > { %v632_v40 = vpop.permute.xlu0 %631 }
 0x19d   : > { %v637_v43 = vsel %vm421_vm0, %v632_v40, 0  ;;  %v509_v21 = vmul.f32 1.442695, %v506_v26 }
 0x19f   : > { %624 = vrot.lane.b32.xlu1 %v1624_v27, %s1725_s26  ;;  %v1987_v27 = vld [vmem:[#allocation2 + $0x28] sm:$0xff] }
 0x1a3   : > { %820 = vrot.lane.b32.xlu1 %v1625_v28, %s1726_s28 }
 0x1a7   : > { %813 = vrot.lane.b32.xlu1 %v1626_v30, %s1726_s28 }
 0x1ab   : > { %1009 = vrot.lane.b32.xlu1 %v1627_v31, %s1727_s29 }
 0x1af   : > { %1002 = vrot.lane.b32.xlu1 %v1628_v32, %s1727_s29 }
 0x216   : > { %v514_v33 = vpop.permute.xlu1 %513 }
 0x217   : > { %v521_v34 = vsub.f32 %v487_v11, %v514_v33  ;;  %v2004_v33 = vld [vmem:[#allocation2 + $0x30] sm:$0xff] }
 0x219   : > { %v523_v35 = vmul.f32 1.442695, %v521_v34 }
 0x21a   : > { %v519_v36 = vpop.permute.xlu1 %518 }
 0x21b   : > { %v522_v37 = vsub.f32 %v490_v14, %v519_v36  ;;  %1633 = vpow2.f32 %v523_v35  ;;  %v2007_v35 = vld [vmem:[#allocation2 + $0x38] sm:$0xff] }
 0x21d   : > { %v525_v38 = vmul.f32 1.442695, %v522_v37 }
 0x21e   : > { %v625_v39 = vpop.permute.xlu1 %624 }
 0x21f   : > { %1635 = vpow2.f32 %v525_v38 }
 0x222   : > { %v821_v45 = vpop.permute.xlu1 %820 }
 0x223   : > { %v826_v47 = vsel %vm421_vm0, %v821_v45, 0 }
 0x225   : > { %v1914_v41 = vpop.eup %1633 }
 0x226   : > { %v814_v46 = vpop.permute.xlu1 %813 }
 0x229   : > { %v1916_v42 = vpop.eup %1635 }
 0x22a   : > { %v556_v44 = vpack.c.bf16 %v1916_v42, %v1914_v41  ;;  %v1010_v48 = vpop.permute.xlu1 %1009  ;;  %v534_v45 = vsel %vm496_vm3, %v1916_v42, 0.0 }
 0x22b   : > { %v1015_v49 = vsel %vm421_vm0, %v1010_v48, 0 }
 0x22c   : > { %1532 = vmatmul.mubr.msk.bf16.vlgmr.msra.gmra.mrb[0].mxu1 %vm496_vm3, %v556_v44  ;;  %v1632_v44 = vld [vmem:[%s1903_s27] sm:$0xff]  }
 0x22d   : > { %1536 = vmatpush3.bf16.xpose.msra.mxu1 %v637_v43  ;;  %1537 = vmatprep.mubr.msk.bf16.mxu1 %vm1722_vm1, %v1721_v6  ;;  %v1631_v43 = vld [vmem:[%s1903_s27] sm:$0xff]  }
 0x22e   : > { %1547 = vmatprep.subr.bf16.mxu1 %v1721_v6  ;;  %v1003_v50 = vpop.permute.xlu1 %1002 }
 0x234   : > { %1538 = vmatmul.mubr.msk.bf16.vlgmr.msra.gmra.mrb[4].mxu1 %vm421_vm0, %v625_v39 }
 0x235   : > { %1548 = vmatpush3.bf16.xpose.msra.mxu1 %v826_v47  ;;  %1549 = vmatprep.mubr.msk.bf16.mxu1 %vm1722_vm1, %v1721_v6 }
 0x236   : > { %1559 = vmatprep.subr.bf16.mxu1 %v1721_v6 }
 0x23c   : > { %1550 = vmatmul.mubr.msk.bf16.vlgmr.msra.gmra.mrb[8].mxu1 %vm421_vm0, %v814_v46  ;;  %v531_v46 = vsel %vm496_vm3, %v1914_v41, 0.0 }
 0x23d   : > { %1560 = vmatpush3.bf16.xpose.msra.mxu1 %v1015_v49  ;;  %1561 = vmatprep.mubr.msk.bf16.mxu1 %vm1722_vm1, %v1721_v6 }
 0x244   : > { %1562 = vmatmul.mubr.msk.bf16.vlgmr.msra.gmra.mrb[12].mxu1 %vm421_vm0, %v1003_v50 }
 0x2ff   : > { %v1935_v51 = vpop.f32.mrb[0].mxu1 }
 0x300   : > { %v1533_v52 = vpop.f32.mrb[1].mxu1 }
 0x301   : > { %v1937_v53 = vpop.f32.mrb[2].mxu1 }
 0x302   : > { %v1534_v54 = vpop.f32.mrb[3].mxu1 }
 0x307   : > { %v1939_v55 = vpop.f32.mrb[4].mxu1 }
 0x308   : > { %v1539_v56 = vpop.f32.mrb[5].mxu1  ;;  %v683_v57 = vsel %vm496_vm3, %v1939_v55, -inf }
 0x309   : > { %684 = vmax.xlane.f32.xlu1 %v683_v57  ;;  %v1943_v58 = vpop.f32.mrb[6].mxu1 }
 0x30a   : > { %v1540_v59 = vpop.f32.mrb[7].mxu1  ;;  %v686_v60 = vsel %vm496_vm3, %v1943_v58, -inf }
 0x30b   : > { %687 = vmax.xlane.f32.xlu0 %v686_v60 }
 0x30f   : > { %v1947_v61 = vpop.f32.mrb[8].mxu1 }
 0x310   : > { %v1551_v62 = vpop.f32.mrb[9].mxu1  ;;  %v872_v63 = vsel %vm496_vm3, %v1947_v61, -inf }
 0x311   : > { %873 = vmax.xlane.f32.xlu0 %v872_v63  ;;  %v1951_v0 = vpop.f32.mrb[10].mxu1 }
 0x312   : > { %v1552_v1 = vpop.f32.mrb[11].mxu1  ;;  %v875_v2 = vsel %vm496_vm3, %v1951_v0, -inf }
 0x313   : > { %876 = vmax.xlane.f32.xlu1 %v875_v2 }
 0x317   : > { %v1955_v3 = vpop.f32.mrb[12].mxu1 }
 0x318   : > { %v1563_v4 = vpop.f32.mrb[13].mxu1  ;;  %v1061_v5 = vsel %vm496_vm3, %v1955_v3, -inf }
 0x319   : > { %1062 = vmax.xlane.f32.xlu0 %v1061_v5  ;;  %v1959_v7 = vpop.f32.mrb[14].mxu1 }
 0x31a   : > { %v1564_v8 = vpop.f32.mrb[15].mxu1  ;;  %v1064_v9 = vsel %vm496_vm3, %v1959_v7, -inf }
 0x31b   : > { %1065 = vmax.xlane.f32.xlu1 %v1064_v9 }
 0x396   : > { %v685_v11 = vpop.xlane.xlu1 %684 }
 0x397   : > { %v1968_v13 = vmax.f32 %v1963_v10, %v685_v11 }
 0x398   : > { %v688_v14 = vpop.xlane.xlu0 %687 }
 0x399   : > { %v691_v15 = vsub.f32 %v1963_v10, %v1968_v13  ;;  %800 = vst.msk [vmem:[#allocation2 + $0x10] sm:$0xff] %vm404_vm2, %v1968_v13  ;;  %v1975_v16 = vmax.f32 %v1965_v12, %v688_v14  ;;  %699 = vperm.xlu0 %1620, %v1968_v13  }
 0x39b   : > { %v692_v18 = vsub.f32 %v1965_v12, %v1975_v16  ;;  %801 = vst.msk [vmem:[#allocation2 + $0x18] sm:$0xff] %vm404_vm2, %v1975_v16  ;;  %704 = vperm.xlu1 %1619, %v1975_v16  }
 0x39d   : > { %1127 = vrot.lane.b32.xlu0 %v1630_v17, %s1727_s29 }
 0x39e   : > { %v874_v24 = vpop.xlane.xlu0 %873 }
 0x39f   : > { %v1990_v28 = vmax.f32 %v1984_v20, %v874_v24 }
 0x3a0   : > { %v877_v29 = vpop.xlane.xlu1 %876 }
 0x3a1   : > { %v880_v30 = vsub.f32 %v1984_v20, %v1990_v28  ;;  %989 = vst.msk [vmem:[#allocation2 + $0x20] sm:$0xff] %vm404_vm2, %v1990_v28  ;;  %v1997_v31 = vmax.f32 %v1987_v27, %v877_v29  ;;  %888 = vperm.xlu1 %1619, %v1990_v28   ;;  %v695_v20 = vmul.f32 1.442695, %v692_v18 }
 0x3a3   : > { %v881_v32 = vsub.f32 %v1987_v27, %v1997_v31  ;;  %990 = vst.msk [vmem:[#allocation2 + $0x28] sm:$0xff] %vm404_vm2, %v1997_v31  ;;  %v528_v27 = vld [vmem:[#allocation3 + $0x8] sm:$0xff] }
 0x3a5   : > { %893 = vperm.xlu1 %1619, %v1997_v31   ;;  %v884_v22 = vmul.f32 1.442695, %v881_v32 }
 0x3a6   : > { %v1063_v34 = vpop.xlane.xlu0 %1062 }
 0x3a7   : > { %v2010_v36 = vmax.f32 %v2004_v33, %v1063_v34  ;;  %v693_v34 = vmul.f32 1.442695, %v691_v15 }
 0x3a8   : > { %v1066_v37 = vpop.xlane.xlu1 %1065 }
 0x3a9   : > { %v1069_v38 = vsub.f32 %v2004_v33, %v2010_v36  ;;  %1178 = vst.msk [vmem:[#allocation2 + $0x30] sm:$0xff] %vm404_vm2, %v2010_v36  ;;  %v2017_v39 = vmax.f32 %v2007_v35, %v1066_v37  ;;  %1077 = vperm.xlu1 %1619, %v2010_v36   ;;  %v882_v37 = vmul.f32 1.442695, %v880_v30 }
 0x3ab   : > { %v1070_v40 = vsub.f32 %v2007_v35, %v2017_v39  ;;  %1179 = vst.msk [vmem:[#allocation2 + $0x38] sm:$0xff] %vm404_vm2, %v2017_v39  ;;  %v1071_v26 = vmul.f32 1.442695, %v1069_v38 }
 0x3ad   : > { %1082 = vperm.xlu1 %1619, %v2017_v39   ;;  %v527_v39 = vld [vmem:[#allocation3] sm:$0xff] }
 0x3b1   : > { %749 = vrot.lane.b32.xlu1 %v1631_v43, %s1725_s26 }
 0x3b5   : > { %938 = vrot.lane.b32.xlu1 %v1632_v44, %s1726_s28 }
 0x3bc   : > { %535 = vadd.xlane.f32.xlu0 %v534_v45 }
 0x3d9   : > { %532 = vadd.xlane.f32.xlu1 %v531_v46 }
 0x418   : > { %v700_v47 = vpop.permute.xlu0 %699 }
 0x419   : > { %v707_v48 = vsub.f32 %v1939_v55, %v700_v47 }
 0x41a   : > { %v705_v49 = vpop.permute.xlu1 %704 }
 0x41b   : > { %v709_v50 = vmul.f32 1.442695, %v707_v48  ;;  %v708_v52 = vsub.f32 %v1943_v58, %v705_v49  ;;  %v714_v49 = vld [vmem:[#allocation3 + $0x10] sm:$0xff] }
 0x41c   : > { %v1128_v10 = vpop.permute.xlu0 %1127 }
 0x41d   : > { %1637 = vpow2.f32 %v709_v50  ;;  %v711_v54 = vmul.f32 1.442695, %v708_v52  ;;  %v715_v50 = vld [vmem:[#allocation3 + $0x18] sm:$0xff] }
 0x41f   : > { %1639 = vpow2.f32 %v711_v54 }
 0x420   : > { %v889_v56 = vpop.permute.xlu1 %888 }
 0x421   : > { %v896_v57 = vsub.f32 %v1947_v61, %v889_v56 }
 0x423   : > { %v898_v59 = vmul.f32 1.442695, %v896_v57 }
 0x424   : > { %v894_v42 = vpop.permute.xlu1 %893 }
 0x425   : > { %1641 = vpow2.f32 %v898_v59  ;;  %v897_v60 = vsub.f32 %v1951_v0, %v894_v42 }
 0x427   : > { %v1638_v41 = vpop.eup %1637  ;;  %v900_v62 = vmul.f32 1.442695, %v897_v60  ;;  %v903_v60 = vld [vmem:[#allocation3 + $0x20] sm:$0xff] }
 0x428   : > { %v1078_v63 = vpop.permute.xlu1 %1077  ;;  %v718_v55 = vsel %vm496_vm3, %v1638_v41, 0.0 }
 0x429   : > { %v1640_v1 = vpop.eup %1639  ;;  %1643 = vpow2.f32 %v900_v62  ;;  %v1085_v58 = vsub.f32 %v1955_v3, %v1078_v63  ;;  %719 = vadd.xlane.f32.xlu1 %v718_v55  ;;  %v507_v3 = vmul.f32 1.442695, %v505_v23  ;;  %v542_v63 = vld [vmem:[#allocation4] sm:$0xff]  ;;  %v904_v55 = vld [vmem:[#allocation3 + $0x28] sm:$0xff] }
 0x42a   : > { %v721_v2 = vsel %vm496_vm3, %v1640_v1, 0.0  ;;  %v743_v4 = vpack.c.bf16 %v1640_v1, %v1638_v41 }
 0x42b   : > { %v1087_v5 = vmul.f32 1.442695, %v1085_v58  ;;  %722 = vadd.xlane.f32.xlu0 %v721_v2 }
 0x42c   : > { %v1083_v61 = vpop.permute.xlu1 %1082 }
 0x42d   : > { %1645 = vpow2.f32 %v1087_v5  ;;  %v1086_v8 = vsub.f32 %v1959_v7, %v1083_v61 }
 0x42f   : > { %v1642_v0 = vpop.eup %1641  ;;  %v1089_v9 = vmul.f32 1.442695, %v1086_v8  ;;  %v1092_v8 = vld [vmem:[#allocation3 + $0x30] sm:$0xff] }
 0x430   : > { %v750_v11 = vpop.permute.xlu1 %749  ;;  %v907_v14 = vsel %vm496_vm3, %v1642_v0, 0.0 }
 0x431   : > { %1647 = vpow2.f32 %v1089_v9  ;;  %908 = vadd.xlane.f32.xlu1 %v907_v14  ;;  %1542 = vmatpush3.bf16.msra.mxu0 %v750_v11 }
 0x432   : > { %1553 = vmatprep.subr.bf16.mxu0 %v1721_v6  ;;  %1649 = vpow2.f32 %v507_v3 }
 0x433   : > { %v1644_v17 = vpop.eup %1643  ;;  %1651 = vpow2.f32 %v693_v34 }
 0x434   : > { %1544 = vmatmul.mubr.msk.bf16.vlgmr.msra.gmra.mrb[4].mxu0 %vm496_vm3, %v743_v4  ;;  %v910_v24 = vsel %vm496_vm3, %v1644_v17, 0.0  ;;  %v939_v7 = vpop.permute.xlu1 %938  ;;  %v932_v29 = vpack.c.bf16 %v1644_v17, %v1642_v0  ;;  %1653 = vpow2.f32 %v509_v21 }
 0x435   : > { %911 = vadd.xlane.f32.xlu1 %v910_v24  ;;  %1554 = vmatpush3.bf16.msra.mxu0 %v939_v7  ;;  %1655 = vpow2.f32 %v882_v37  ;;  %v1093_v24 = vld [vmem:[#allocation3 + $0x38] sm:$0xff]  ;;  %v543_v37 = vld [vmem:[#allocation4 + $0x8] sm:$0xff] }
 0x436   : > { %1555 = vmatprep.mubr.msk.bf16.mxu0 %vm1722_vm1, %v1721_v6  ;;  %1565 = vmatprep.subr.bf16.mxu0 %v1721_v6  ;;  %1657 = vpow2.f32 %v884_v22 }
 0x437   : > { %v1646_v19 = vpop.eup %1645  ;;  %1659 = vpow2.f32 %v1071_v26 }
 0x438   : > { %v1096_v23 = vsel %vm496_vm3, %v1646_v19, 0.0  ;;  %1661 = vpow2.f32 %v695_v20 }
 0x439   : > { %1097 = vadd.xlane.f32.xlu1 %v1096_v23 }
 0x43b   : > { %v1648_v13 = vpop.eup %1647 }
 0x43c   : > { %1556 = vmatmul.mubr.msk.bf16.vlgmr.msra.gmra.mrb[8].mxu0 %vm496_vm3, %v932_v29  ;;  %v1099_v15 = vsel %vm496_vm3, %v1648_v13, 0.0  ;;  %v1121_v43 = vpack.c.bf16 %v1648_v13, %v1646_v19  ;;  %v1650_v25 = vpop.eup %1649 }
 0x43d   : > { %1100 = vadd.xlane.f32.xlu1 %v1099_v15  ;;  %1566 = vmatpush3.bf16.msra.mxu0 %v1128_v10  ;;  %v1652_v28 = vpop.eup %1651 }
 0x43e   : > { %1567 = vmatprep.mubr.msk.bf16.mxu0 %vm1722_vm1, %v1721_v6  ;;  %v1654_v30 = vpop.eup %1653  ;;  %v1073_v6 = vmul.f32 1.442695, %v1070_v40  ;;  %v529_v40 = vmul.f32 %v1650_v25, %v527_v39  ;;  %v716_v52 = vmul.f32 %v1652_v28, %v714_v49  ;;  %v729_v39 = vld [vmem:[#allocation4 + $0x10] sm:$0xff] }
 0x43f   : > { %v1656_v31 = vpop.eup %1655  ;;  %v530_v32 = vmul.f32 %v1654_v30, %v528_v27 }
 0x440   : > { %1663 = vpow2.f32 %v1073_v6  ;;  %v1658_v12 = vpop.eup %1657  ;;  %v905_v41 = vmul.f32 %v1656_v31, %v903_v60 }
 0x441   : > { %546 = vperm.xlu0 %1620, %v1650_v25   ;;  %v1660_v16 = vpop.eup %1659  ;;  %v906_v5 = vmul.f32 %v1658_v12, %v904_v55 }
 0x442   : > { %v1662_v18 = vpop.eup %1661  ;;  %v1094_v3 = vmul.f32 %v1660_v16, %v1092_v8 }
 0x443   : > { %v717_v57 = vmul.f32 %v1662_v18, %v715_v50 }
 0x444   : > { %1568 = vmatmul.mubr.msk.bf16.vlgmr.msra.gmra.mrb[12].mxu0 %vm496_vm3, %v1121_v43 }
 0x445   : > { %733 = vperm.xlu0 %1620, %v1652_v28  }
 0x449   : > { %v536_v33 = vpop.xlane.xlu0 %535  ;;  %922 = vperm.xlu0 %1620, %v1656_v31  }
 0x44a   : > { %v538_v36 = vadd.f32 %v536_v33, %v530_v32  ;;  %v1664_v44 = vpop.eup %1663 }
 0x44b   : > { %v1095_v19 = vmul.f32 %v1664_v44, %v1093_v24 }
 0x44c   : > { %541 = vst.msk [vmem:[#allocation3 + $0x8] sm:$0xff] %vm404_vm2, %v538_v36 }
 0x44d   : > { %927 = vperm.xlu0 %1620, %v1658_v12  }
 0x44e   : > { %551 = vperm.xlu1 %1619, %v1654_v30  }
 0x451   : > { %1111 = vperm.xlu0 %1620, %v1660_v16  }
 0x452   : > { %738 = vperm.xlu1 %1619, %v1662_v18  }
 0x453   : > { %v1186_v38 = vld [vmem:[#allocation3 + $0x8] sm:$0xff] }
 0x454   : > { %1665 = vrcp.f32 %v1186_v38 }
 0x455   : > { %1116 = vperm.xlu0 %1620, %v1664_v44  }
 0x45e   : > { %v1666_v35 = vpop.eup %1665 }
 0x45f   : > { %1196 = vperm.xlu0 %1620, %v1666_v35  }
 0x466   : > { %v533_v45 = vpop.xlane.xlu1 %532 }
 0x467   : > { %v537_v46 = vadd.f32 %v533_v45, %v529_v40  ;;  %v730_v40 = vld [vmem:[#allocation4 + $0x18] sm:$0xff] }
 0x469   : > { %540 = vst.msk [vmem:[#allocation3] sm:$0xff] %vm404_vm2, %v537_v46 }
 0x470   : > { %v1185_v47 = vld [vmem:[#allocation3] sm:$0xff] }
 0x471   : > { %1667 = vrcp.f32 %v1185_v47 }
 0x47b   : > { %v1668_v48 = vpop.eup %1667 }
 0x47c   : > { %1191 = vperm.xlu1 %1619, %v1668_v48  }
 0x4b6   : > { %v720_v54 = vpop.xlane.xlu1 %719 }
 0x4b7   : > { %v724_v56 = vadd.f32 %v720_v54, %v716_v52 }
 0x4b8   : > { %v723_v59 = vpop.xlane.xlu0 %722 }
 0x4b9   : > { %726 = vst.msk [vmem:[#allocation3 + $0x10] sm:$0xff] %vm404_vm2, %v724_v56  ;;  %v725_v42 = vadd.f32 %v723_v59, %v717_v57  ;;  %v918_v56 = vld [vmem:[#allocation4 + $0x20] sm:$0xff]  ;;  %v919_v57 = vld [vmem:[#allocation4 + $0x28] sm:$0xff] }
 0x4bb   : > { %727 = vst.msk [vmem:[#allocation3 + $0x18] sm:$0xff] %vm404_vm2, %v725_v42 }
 0x4be   : > { %v909_v62 = vpop.xlane.xlu1 %908 }
 0x4bf   : > { %v913_v1 = vadd.f32 %v909_v62, %v905_v41 }
 0x4c0   : > { %v547_v58 = vpop.permute.xlu0 %546  ;;  %v1214_v2 = vld [vmem:[#allocation3 + $0x10] sm:$0xff] }
 0x4c1   : > { %915 = vst.msk [vmem:[#allocation3 + $0x20] sm:$0xff] %vm404_vm2, %v913_v1  ;;  %v554_v4 = vmul.f32 %v547_v58, %v542_v63  ;;  %1669 = vrcp.f32 %v1214_v2  ;;  %v1107_v58 = vld [vmem:[#allocation4 + $0x30] sm:$0xff]  ;;  %v1108_v2 = vld [vmem:[#allocation4 + $0x38] sm:$0xff] }
 0x4c2   : > { %v912_v61 = vpop.xlane.xlu1 %911  ;;  %v1215_v0 = vld [vmem:[#allocation3 + $0x18] sm:$0xff] }
 0x4c3   : > { %v607_v9 = vadd.f32 %v1935_v51, %v554_v4  ;;  %v914_v11 = vadd.f32 %v912_v61, %v906_v5  ;;  %1671 = vrcp.f32 %v1215_v0 }
 0x4c4   : > { %v734_v14 = vpop.permute.xlu0 %733 }
 0x4c5   : > { %609 = vst.msk [vmem:[#allocation4] sm:$0xff] %vm421_vm0, %v607_v9  ;;  %v741_v45 = vmul.f32 %v734_v14, %v729_v39 }
 0x4c6   : > { %916 = vst.msk [vmem:[#allocation3 + $0x28] sm:$0xff] %vm404_vm2, %v914_v11  ;;  %v1098_v17 = vpop.xlane.xlu1 %1097 }
 0x4c7   : > { %v1102_v7 = vadd.f32 %v1098_v17, %v1094_v3 }
 0x4c8   : > { %v2086_v29 = vpop.permute.xlu0 %922  ;;  %v1247_v34 = vld [vmem:[#allocation3 + $0x20] sm:$0xff] }
 0x4c9   : > { %1104 = vst.msk [vmem:[#allocation3 + $0x30] sm:$0xff] %vm404_vm2, %v1102_v7  ;;  %1673 = vrcp.f32 %v1247_v34  ;;  %v930_v59 = vmul.f32 %v2086_v29, %v918_v56 }
 0x4ca   : > { %v1101_v21 = vpop.xlane.xlu1 %1100 }
 0x4cb   : > { %v1670_v51 = vpop.eup %1669  ;;  %v1103_v23 = vadd.f32 %v1101_v21, %v1095_v19 }
 0x4cc   : > { %1220 = vperm.xlu1 %1619, %v1670_v51   ;;  %v928_v15 = vpop.permute.xlu0 %927  ;;  %v1183_v18 = vld [vmem:[#allocation4] sm:$0xff] }
 0x4cd   : > { %v1248_v10 = vld [vmem:[#allocation3 + $0x28] sm:$0xff]  ;;  %v1672_v13 = vpop.eup %1671  ;;  %1105 = vst.msk [vmem:[#allocation3 + $0x38] sm:$0xff] %vm404_vm2, %v1103_v23  ;;  %v931_v60 = vmul.f32 %v928_v15, %v919_v57 }
 0x4ce   : > { %1675 = vrcp.f32 %v1248_v10  ;;  %1225 = vperm.xlu0 %1620, %v1672_v13   ;;  %v552_v43 = vpop.permute.xlu1 %551 }
 0x4cf   : > { %v555_v22 = vmul.f32 %v552_v43, %v543_v37 }
 0x4d0   : > { %v1280_v25 = vld [vmem:[#allocation3 + $0x30] sm:$0xff]  ;;  %v1112_v28 = vpop.permute.xlu0 %1111 }
 0x4d1   : > { %v608_v26 = vadd.f32 %v1937_v53, %v555_v22  ;;  %1677 = vrcp.f32 %v1280_v25  ;;  %v1119_v4 = vmul.f32 %v1112_v28, %v1107_v58 }
 0x4d2   : > { %v739_v16 = vpop.permute.xlu1 %738 }
 0x4d3   : > { %v1674_v20 = vpop.eup %1673  ;;  %610 = vst.msk [vmem:[#allocation4 + $0x8] sm:$0xff] %vm421_vm0, %v608_v26  ;;  %v742_v47 = vmul.f32 %v739_v16, %v730_v40 }
 0x4d4   : > { %1253 = vperm.xlu1 %1619, %v1674_v20   ;;  %v1281_v30 = vld [vmem:[#allocation3 + $0x38] sm:$0xff]  ;;  %v1117_v6 = vpop.permute.xlu0 %1116 }
 0x4d5   : > { %1679 = vrcp.f32 %v1281_v30  ;;  %v1120_v61 = vmul.f32 %v1117_v6, %v1108_v2 }
 0x4d8   : > { %v1676_v27 = vpop.eup %1675 }
 0x4d9   : > { %1258 = vperm.xlu0 %1620, %v1676_v27  }
 0x4da   : > { %v1184_v33 = vld [vmem:[#allocation4 + $0x8] sm:$0xff] }
 0x4db   : > { %v1678_v31 = vpop.eup %1677 }
 0x4dc   : > { %1286 = vperm.xlu1 %1619, %v1678_v31  }
 0x4de   : > { %v1197_v32 = vpop.permute.xlu0 %1196 }
 0x4df   : > { %v1680_v36 = vpop.eup %1679  ;;  %v1200_v53 = vmul.f32 %v1197_v32, %v1184_v33 }
 0x4e0   : > { %1291 = vperm.xlu0 %1620, %v1680_v36  }
 0x4e1   : > { %v1500_v12 = vpack.c.bf16 %v1200_v53, %v1200_v53 }
 0x4e3   : > { %1211 = vst.msk [vmem:[%s2097_s6 + $0x4] sm:$0xf] %vm1209_vm4, %v1500_v12 }
 0x4fb   : > { %v1192_v38 = vpop.permute.xlu1 %1191 }
 0x4fc   : > { %v1199_v44 = vmul.f32 %v1192_v38, %v1183_v18 }
 0x4fe   : > { %v1499_v35 = vpack.c.bf16 %v1199_v44, %v1199_v44 }
 0x500   : > { %1210 = vst.msk [vmem:[%s2097_s6] sm:$0xf] %vm1209_vm4, %v1499_v35 }
 0x507   : > { %v789_v46 = vpop.f32.mrb[4].mxu0 }
 0x508   : > { %v796_v48 = vadd.f32 %v789_v46, %v741_v45  ;;  %v1545_v49 = vpop.f32.mrb[5].mxu0 }
 0x509   : > { %v792_v50 = vpop.f32.mrb[6].mxu0 }
 0x50a   : > { %798 = vst.msk [vmem:[#allocation4 + $0x10] sm:$0xff] %vm421_vm0, %v796_v48  ;;  %v797_v52 = vadd.f32 %v792_v50, %v742_v47  ;;  %v1546_v54 = vpop.f32.mrb[7].mxu0 }
 0x50c   : > { %799 = vst.msk [vmem:[#allocation4 + $0x18] sm:$0xff] %vm421_vm0, %v797_v52 }
 0x50f   : > { %v978_v42 = vpop.f32.mrb[8].mxu0 }
 0x510   : > { %v985_v41 = vadd.f32 %v978_v42, %v930_v59  ;;  %v1557_v62 = vpop.f32.mrb[9].mxu0 }
 0x511   : > { %v981_v63 = vpop.f32.mrb[10].mxu0  ;;  %v1212_v17 = vld [vmem:[#allocation4 + $0x10] sm:$0xff] }
 0x512   : > { %987 = vst.msk [vmem:[#allocation4 + $0x20] sm:$0xff] %vm421_vm0, %v985_v41  ;;  %v986_v55 = vadd.f32 %v981_v63, %v931_v60  ;;  %v1558_v1 = vpop.f32.mrb[11].mxu0 }
 0x513   : > { %v1213_v29 = vld [vmem:[#allocation4 + $0x18] sm:$0xff] }
 0x514   : > { %988 = vst.msk [vmem:[#allocation4 + $0x28] sm:$0xff] %vm421_vm0, %v986_v55 }
 0x517   : > { %v1167_v5 = vpop.f32.mrb[12].mxu0 }
 0x518   : > { %v1174_v8 = vadd.f32 %v1167_v5, %v1119_v4  ;;  %v1569_v0 = vpop.f32.mrb[13].mxu0 }
 0x519   : > { %v1170_v9 = vpop.f32.mrb[14].mxu0  ;;  %v1245_v23 = vld [vmem:[#allocation4 + $0x20] sm:$0xff] }
 0x51a   : > { %1176 = vst.msk [vmem:[#allocation4 + $0x30] sm:$0xff] %vm421_vm0, %v1174_v8  ;;  %v1175_v11 = vadd.f32 %v1170_v9, %v1120_v61  ;;  %v1570_v14 = vpop.f32.mrb[15].mxu0 }
 0x51b   : > { %v1246_v15 = vld [vmem:[#allocation4 + $0x28] sm:$0xff] }
 0x51c   : > { %1177 = vst.msk [vmem:[#allocation4 + $0x38] sm:$0xff] %vm421_vm0, %v1175_v11 }
 0x521   : > { %v1278_v26 = vld [vmem:[#allocation4 + $0x30] sm:$0xff] }
 0x523   : > { %v1279_v27 = vld [vmem:[#allocation4 + $0x38] sm:$0xff] }
 0x54b   : > { %v1221_v3 = vpop.permute.xlu1 %1220 }
 0x54c   : > { %v1228_v24 = vmul.f32 %v1221_v3, %v1212_v17 }
 0x54d   : > { %v1226_v7 = vpop.permute.xlu0 %1225 }
 0x54e   : > { %v1501_v34 = vpack.c.bf16 %v1228_v24, %v1228_v24  ;;  %v1229_v19 = vmul.f32 %v1226_v7, %v1213_v29 }
 0x550   : > { %v1502_v21 = vpack.c.bf16 %v1229_v19, %v1229_v19  ;;  %1236 = vrot.lane.b32.xlu1 %v1501_v34, %s1727_s29 }
 0x552   : > { %1238 = vrot.lane.b32.xlu0 %v1502_v21, %s1727_s29 }
 0x553   : > { %v1254_v51 = vpop.permute.xlu1 %1253 }
 0x554   : > { %v1261_v37 = vmul.f32 %v1254_v51, %v1245_v23 }
 0x556   : > { %v1503_v10 = vpack.c.bf16 %v1261_v37, %v1261_v37 }
 0x558   : > { %v1259_v13 = vpop.permute.xlu0 %1258  ;;  %1269 = vrot.lane.b32.xlu1 %v1503_v10, %s1726_s28 }
 0x559   : > { %v1262_v43 = vmul.f32 %v1259_v13, %v1246_v15 }
 0x55b   : > { %v1504_v22 = vpack.c.bf16 %v1262_v43, %v1262_v43  ;;  %v1287_v25 = vpop.permute.xlu1 %1286 }
 0x55c   : > { %v1294_v20 = vmul.f32 %v1287_v25, %v1278_v26 }
 0x55d   : > { %1271 = vrot.lane.b32.xlu0 %v1504_v22, %s1726_s28 }
 0x55e   : > { %v1505_v28 = vpack.c.bf16 %v1294_v20, %v1294_v20 }
 0x55f   : > { %v1292_v30 = vpop.permute.xlu0 %1291 }
 0x560   : > { %v1295_v6 = vmul.f32 %v1292_v30, %v1279_v27  ;;  %1302 = vrot.lane.b32.xlu1 %v1505_v28, %s1725_s26 }
 0x562   : > { %v1506_v31 = vpack.c.bf16 %v1295_v6, %v1295_v6 }
 0x564   : > { %1304 = vrot.lane.b32.xlu0 %v1506_v31, %s1725_s26 }
 0x5c2   : > { %v1237_v32 = vpop.permute.xlu1 %1236 }
 0x5c3   : > { %1243 = vst.msk [vmem:[%s2097_s6] sm:$0xf] %vm1242_vm5, %v1237_v32 }
 0x5c4   : > { %v1239_v33 = vpop.permute.xlu0 %1238 }
 0x5c5   : > { %1244 = vst.msk [vmem:[%s2097_s6 + $0x4] sm:$0xf] %vm1242_vm5, %v1239_v33 }
 0x5ca   : > { %v1270_v36 = vpop.permute.xlu1 %1269 }
 0x5cb   : > { %1276 = vst.msk [vmem:[%s2097_s6] sm:$0xf] %vm1275_vm6, %v1270_v36 }
 0x5cf   : > { %v1272_v53 = vpop.permute.xlu0 %1271 }
 0x5d0   : > { %1277 = vst.msk [vmem:[%s2097_s6 + $0x4] sm:$0xf] %vm1275_vm6, %v1272_v53 }
 0x5d2   : > { %v1303_v12 = vpop.permute.xlu1 %1302 }
 0x5d3   : > { %1309 = vst.msk [vmem:[%s2097_s6] sm:$0xf] %vm1308_vm7, %v1303_v12 }
 0x5d6   : > { %v1305_v16 = vpop.permute.xlu0 %1304 }
 0x5d7   : > { %1310 = vst.msk [vmem:[%s2097_s6 + $0x4] sm:$0xf] %vm1308_vm7, %v1305_v16 }
 0x5d8 PF: > { %s13_s16 = sadd.s32 1, %s1719_s16   ;;  %s2140_s12 = smov %s1707_s13 }
 0x5d9   : > { %p10_p10 = scmp.ge.s32.totalorder %s13_s16, 4   ;;  %s2141_s13 = smov %s1787_s21 }
 0x5da   : > { %s2142_s14 = smov %s1715_s15  ;;  %s2143_s15 = smov %s2145_s17 }
 0x5db   :  { %12 = sbr.rel (!%p10_p10) target bundleno = 3 (0x3), region = 223 }

</bundles_post_ra>
